<compile_context>
chip_gen: v6e
topology: v6e:2x2x1
jax: 0.10.0
libtpu: 0.0.40
codegen_flags: <defaults>
</compile_context>

<pallas_src>
import functools

import jax
import jax.numpy as jnp
from jax import lax
from jax.experimental import pallas as pl
from jax.experimental.pallas import tpu as pltpu


# ----------------------------- kernel ---------------------------------------


def _layernorm(x, w, b, eps=1e-5):
    mu = jnp.mean(x, axis=-1, keepdims=True)
    var = jnp.mean((x - mu) ** 2, axis=-1, keepdims=True)
    return (x - mu) * lax.rsqrt(var + eps) * w + b


def gpt_kernel(mask_ref, x_ref,
               ln1w_ref, ln1b_ref, wqkv_ref, wo_ref, bo_ref,
               ln2w_ref, ln2b_ref, w1_ref, b1_ref, w2_ref, b2_ref,
               lnfw_ref, lnfb_ref, lmw_ref, lmb_ref,
               o_ref, x_scr, *, num_heads):
    """One grid step = one transformer layer for one batch row.

    grid = (batch, num_layers). x_scr (VMEM scratch) carries the activation
    across the layer axis; logits are emitted at the last layer only.
    """
    layer = pl.program_id(1)
    num_layers = pl.num_programs(1)

    @pl.when(layer == 0)
    def _():
        x_scr[...] = x_ref[0]                       # load embeddings once per batch row

    x = x_scr[...]                                  # (T, C) f32
    T, C = x.shape
    H = num_heads
    D = C // H
    bf16 = jnp.bfloat16
    f32 = jnp.float32
    scale = D ** -0.5

    mask = mask_ref[...]                            # (T, T) additive causal mask

    # ---- causal multi-head self-attention (pre-norm) ----
    y = _layernorm(x, ln1w_ref[0], ln1b_ref[0])
    qkv = jnp.dot(y.astype(bf16), wqkv_ref[0],
                  preferred_element_type=f32)       # (T, 3C), one fused MXU matmul

    attn = jnp.zeros((T, C), f32)
    for h in range(H):                              # static unroll; heads are tiny (D=8)
        qh = qkv[:, h * D:(h + 1) * D].astype(bf16)
        kh = qkv[:, C + h * D:C + (h + 1) * D].astype(bf16)
        vh = qkv[:, 2 * C + h * D:2 * C + (h + 1) * D].astype(bf16)
        # s = q @ k^T without materializing a transpose
        s = lax.dot_general(qh, kh, (((1,), (1,)), ((), ())),
                            preferred_element_type=f32) * scale
        s = s + mask
        s = s - jnp.max(s, axis=-1, keepdims=True)
        p = jnp.exp(s)
        p = p * pl.reciprocal(jnp.sum(p, axis=-1, keepdims=True), approx=True)
        ctx = jnp.dot(p.astype(bf16), vh, preferred_element_type=f32)   # (T, D)
        # out-projection contribution of this head: (T, D) @ (D, C)
        attn = attn + jnp.dot(ctx.astype(bf16), wo_ref[0, h],
                              preferred_element_type=f32)
    x = x + attn + bo_ref[0]

    # ---- MLP (4x expansion, ReLU) ----
    y2 = _layernorm(x, ln2w_ref[0], ln2b_ref[0])
    h1 = jnp.dot(y2.astype(bf16), w1_ref[0], preferred_element_type=f32) + b1_ref[0]
    h1 = jnp.maximum(h1, 0.0)
    h2 = jnp.dot(h1.astype(bf16), w2_ref[0], preferred_element_type=f32) + b2_ref[0]
    x = x + h2
    x_scr[...] = x

    # ---- final LayerNorm + lm_head, fused into the last layer step ----
    @pl.when(layer == num_layers - 1)
    def _():
        yf = _layernorm(x, lnfw_ref[...], lnfb_ref[...])
        o_ref[0] = jnp.dot(yf.astype(bf16), lmw_ref[...],
                           preferred_element_type=f32) + lmb_ref[...]


# --------------------------- pallas wrapper ----------------------------------


def run_gpt(x, mask, params, num_heads):
    """x: [B, T, C] f32 embeddings -> padded logits [B, T, V_pad] f32."""
    B, T, C = x.shape
    L = params['ln1_w'].shape[0]
    F = params['w1'].shape[2]
    V_pad = params['lm_w'].shape[1]
    H = num_heads
    D = C // H

    def lyr(nz):                 # per-layer tensor: index by layer, nz trailing zeros
        return lambda b, l: (l,) + (0,) * nz

    def glb(nz):                 # shared tensor: same block every step (DMA'd once)
        return lambda b, l: (0,) * nz

    grid_spec = pltpu.PrefetchScalarGridSpec(
        num_scalar_prefetch=0,
        grid=(B, L),
        in_specs=[
            pl.BlockSpec((T, T), glb(2)),                       # causal mask
            pl.BlockSpec((1, T, C), lambda b, l: (b, 0, 0)),    # embeddings
            pl.BlockSpec((1, 1, C), lyr(2)),                    # ln1_w
            pl.BlockSpec((1, 1, C), lyr(2)),                    # ln1_b
            pl.BlockSpec((1, C, 3 * C), lyr(2)),                # wqkv
            pl.BlockSpec((1, H, D, C), lyr(3)),                 # wo (head-major)
            pl.BlockSpec((1, 1, C), lyr(2)),                    # bo
            pl.BlockSpec((1, 1, C), lyr(2)),                    # ln2_w
            pl.BlockSpec((1, 1, C), lyr(2)),                    # ln2_b
            pl.BlockSpec((1, C, F), lyr(2)),                    # w1
            pl.BlockSpec((1, 1, F), lyr(2)),                    # b1
            pl.BlockSpec((1, F, C), lyr(2)),                    # w2
            pl.BlockSpec((1, 1, C), lyr(2)),                    # b2
            pl.BlockSpec((1, C), glb(2)),                       # lnf_w
            pl.BlockSpec((1, C), glb(2)),                       # lnf_b
            pl.BlockSpec((C, V_pad), glb(2)),                   # lm_w (padded)
            pl.BlockSpec((1, V_pad), glb(2)),                   # lm_b (padded)
        ],
        out_specs=pl.BlockSpec((1, T, V_pad), lambda b, l: (b, 0, 0)),
        scratch_shapes=[pltpu.VMEM((T, C), jnp.float32)],
    )

    return pl.pallas_call(
        functools.partial(gpt_kernel, num_heads=num_heads),
        out_shape=jax.ShapeDtypeStruct((B, T, V_pad), jnp.float32),
        grid_spec=grid_spec,
        compiler_params=pltpu.CompilerParams(
            dimension_semantics=("parallel", "arbitrary")),
    )(mask, x,
      params['ln1_w'], params['ln1_b'], params['wqkv'], params['wo'],
      params['bo'], params['ln2_w'], params['ln2_b'],
      params['w1'], params['b1'], params['w2'], params['b2'],
      params['lnf_w'], params['lnf_b'], params['lm_w'], params['lm_b'])


# ----------------------------- model glue -----------------------------------


def init_params(key, vocab_size, num_embd, block_size, num_layers, num_heads):
    std = 0.02
    C, H, L = num_embd, num_heads, num_layers
    D = C // H
    F = 4 * C
    V_pad = ((vocab_size + 127) // 128) * 128        # lane-dense lm_head output
    k_tok, k_pos, k_lm, k_qkv, k_wo, k_w1, k_w2 = jax.random.split(key, 7)

    def nrm(k, shape, dtype=jnp.float32):
        return (std * jax.random.normal(k, shape)).astype(dtype)

    lm_w = jnp.zeros((C, V_pad), jnp.bfloat16)
    lm_w = lm_w.at[:, :vocab_size].set(nrm(k_lm, (C, vocab_size), jnp.bfloat16))

    return {
        'vocab_size': vocab_size,
        'tok_tbl': nrm(k_tok, (vocab_size, C)),
        'pos_tbl': nrm(k_pos, (block_size, C)),
        'lnf_w': jnp.ones((1, C), jnp.float32),
        'lnf_b': jnp.zeros((1, C), jnp.float32),
        'lm_w': lm_w,
        'lm_b': jnp.zeros((1, V_pad), jnp.float32),
        # stacked per-layer params (leading layer axis)
        'ln1_w': jnp.ones((L, 1, C), jnp.float32),
        'ln1_b': jnp.zeros((L, 1, C), jnp.float32),
        'wqkv': nrm(k_qkv, (L, C, 3 * C), jnp.bfloat16),   # fused q/k/v projection
        'wo':   nrm(k_wo, (L, H, D, C), jnp.bfloat16),     # out-proj, head-major rows
        'bo':   jnp.zeros((L, 1, C), jnp.float32),
        'ln2_w': jnp.ones((L, 1, C), jnp.float32),
        'ln2_b': jnp.zeros((L, 1, C), jnp.float32),
        'w1':   nrm(k_w1, (L, C, F), jnp.bfloat16),
        'b1':   jnp.zeros((L, 1, F), jnp.float32),
        'w2':   nrm(k_w2, (L, F, C), jnp.bfloat16),
        'b2':   jnp.zeros((L, 1, C), jnp.float32),
    }


def character_gpt_forward(params, context, num_heads, target=None):
    """context: int32 [B, T] token ids -> (logits [B, T, vocab], loss)."""
    B, T = context.shape
    V = params['vocab_size']

    # Embedding lookups are gathers -> plain JAX glue outside the kernel.
    tkn_emb = params['tok_tbl'][context]               # [B, T, C]
    pos_emb = params['pos_tbl'][:T]                    # [T, C]
    x = (tkn_emb + pos_emb[None, :, :]).astype(jnp.float32)

    # Additive causal mask, built once (hoisted out of the layer loop).
    idx = jnp.arange(T)
    mask = jnp.where(idx[None, :] <= idx[:, None], 0.0, -1e30).astype(jnp.float32)

    logits_pad = run_gpt(x, mask, params, num_heads)   # [B, T, V_pad]
    logits = logits_pad[..., :V]                       # drop vocab padding

    loss = None
    if target is not None:
        flat = logits.reshape(B * T, V)
        lse = jax.nn.logsumexp(flat, axis=-1)
        picked = jnp.take_along_axis(flat, target.reshape(-1, 1), axis=-1)[:, 0]
        loss = jnp.mean(lse - picked)
    return logits, loss


# ------------------------------- main ---------------------------------------


if __name__ == "__main__":
    # small config consistent with the bigram-tutorial CharacterGPT
    vocab_size, num_embd, block_size, num_layers, num_heads = 65, 32, 8, 2, 4
    batch, T = 2, 8

    key = jax.random.PRNGKey(0)
    pkey, ckey = jax.random.split(key)
    params = init_params(pkey, vocab_size, num_embd, block_size, num_layers, num_heads)
    context = jax.random.randint(ckey, (batch, T), 0, vocab_size, dtype=jnp.int32)

    logits, loss = character_gpt_forward(params, context, num_heads, target=None)
    logits = jax.block_until_ready(logits)

    assert logits.shape == (batch, T, vocab_size)
    assert loss is None
    assert bool(jnp.all(jnp.isfinite(logits)))
    print("KERNEL_OK")
</pallas_src>

<mosaic_0001>
module attributes {stable_mosaic.version = 11 : i64} {
  func.func @gpt_kernel(%arg0: i32, %arg1: i32, %arg2: memref<8x8xf32, #tpu.memory_space<vmem>>, %arg3: memref<1x8x32xf32, #tpu.memory_space<vmem>>, %arg4: memref<1x1x32xf32, #tpu.memory_space<vmem>>, %arg5: memref<1x1x32xf32, #tpu.memory_space<vmem>>, %arg6: memref<1x32x96xbf16, #tpu.memory_space<vmem>>, %arg7: memref<1x4x8x32xbf16, #tpu.memory_space<vmem>>, %arg8: memref<1x1x32xf32, #tpu.memory_space<vmem>>, %arg9: memref<1x1x32xf32, #tpu.memory_space<vmem>>, %arg10: memref<1x1x32xf32, #tpu.memory_space<vmem>>, %arg11: memref<1x32x128xbf16, #tpu.memory_space<vmem>>, %arg12: memref<1x1x128xf32, #tpu.memory_space<vmem>>, %arg13: memref<1x128x32xbf16, #tpu.memory_space<vmem>>, %arg14: memref<1x1x32xf32, #tpu.memory_space<vmem>>, %arg15: memref<1x32xf32, #tpu.memory_space<vmem>>, %arg16: memref<1x32xf32, #tpu.memory_space<vmem>>, %arg17: memref<32x128xbf16, #tpu.memory_space<vmem>>, %arg18: memref<1x128xf32, #tpu.memory_space<vmem>>, %arg19: memref<1x8x128xf32, #tpu.memory_space<vmem>>, %arg20: memref<8x32xf32, #tpu.memory_space<vmem>>) attributes {dimension_semantics = [#tpu.dimension_semantics<parallel>, #tpu.dimension_semantics<arbitrary>], iteration_bounds = array<i64: 2, 2>, scalar_prefetch = 0 : i64, scratch_operands = 1 : i64, tpu.core_type = #tpu.core_type<tc>, window_params = [{pipeline_mode = #tpu.pipeline_mode<synchronous>, transform_indices = @transform_0, window_bounds = array<i64: 8, 8>}, {transform_indices = @transform_1, window_bounds = array<i64: 1, 8, 32>}, {transform_indices = @transform_2, window_bounds = array<i64: 1, 1, 32>}, {transform_indices = @transform_3, window_bounds = array<i64: 1, 1, 32>}, {transform_indices = @transform_4, window_bounds = array<i64: 1, 32, 96>}, {transform_indices = @transform_5, window_bounds = array<i64: 1, 4, 8, 32>}, {transform_indices = @transform_6, window_bounds = array<i64: 1, 1, 32>}, {transform_indices = @transform_7, window_bounds = array<i64: 1, 1, 32>}, {transform_indices = @transform_8, window_bounds = array<i64: 1, 1, 32>}, {transform_indices = @transform_9, window_bounds = array<i64: 1, 32, 128>}, {transform_indices = @transform_10, window_bounds = array<i64: 1, 1, 128>}, {transform_indices = @transform_11, window_bounds = array<i64: 1, 128, 32>}, {transform_indices = @transform_12, window_bounds = array<i64: 1, 1, 32>}, {pipeline_mode = #tpu.pipeline_mode<synchronous>, transform_indices = @transform_13, window_bounds = array<i64: 1, 32>}, {pipeline_mode = #tpu.pipeline_mode<synchronous>, transform_indices = @transform_14, window_bounds = array<i64: 1, 32>}, {pipeline_mode = #tpu.pipeline_mode<synchronous>, transform_indices = @transform_15, window_bounds = array<i64: 32, 128>}, {pipeline_mode = #tpu.pipeline_mode<synchronous>, transform_indices = @transform_16, window_bounds = array<i64: 1, 128>}, {transform_indices = @transform_17, window_bounds = array<i64: 1, 8, 128>}]} {
    %c0_i32 = arith.constant 0 : i32
    %0 = arith.cmpi eq, %arg1, %c0_i32 : i32
    %1 = arith.extui %0 : i1 to i32
    %c0_i32_0 = arith.constant 0 : i32
    %2 = arith.cmpi ne, %1, %c0_i32_0 : i32
    scf.if %2 {
      %c0_88 = arith.constant 0 : index
      %c0_89 = arith.constant 0 : index
      %c0_90 = arith.constant 0 : index
      %198 = vector.load %arg3[%c0_88, %c0_89, %c0_90] : memref<1x8x32xf32, #tpu.memory_space<vmem>>, vector<1x8x32xf32>
      %199 = vector.shape_cast %198 : vector<1x8x32xf32> to vector<8x32xf32>
      %c0_91 = arith.constant 0 : index
      %c0_92 = arith.constant 0 : index
      %200 = vector.load %arg20[%c0_91, %c0_92] : memref<8x32xf32, #tpu.memory_space<vmem>>, vector<8x32xf32>
      tpu.vector_store %arg20[%c0_91, %c0_92], %199 {strides = array<i32>} : memref<8x32xf32, #tpu.memory_space<vmem>>, vector<8x32xf32>,
    } else {
    }
    %c0 = arith.constant 0 : index
    %c0_1 = arith.constant 0 : index
    %3 = vector.load %arg20[%c0, %c0_1] : memref<8x32xf32, #tpu.memory_space<vmem>>, vector<8x32xf32>
    %c0_2 = arith.constant 0 : index
    %c0_3 = arith.constant 0 : index
    %4 = vector.load %arg2[%c0_2, %c0_3] : memref<8x8xf32, #tpu.memory_space<vmem>>, vector<8x8xf32>
    %c0_4 = arith.constant 0 : index
    %c0_5 = arith.constant 0 : index
    %c0_6 = arith.constant 0 : index
    %5 = vector.load %arg4[%c0_4, %c0_5, %c0_6] : memref<1x1x32xf32, #tpu.memory_space<vmem>>, vector<1x1x32xf32>
    %6 = vector.shape_cast %5 : vector<1x1x32xf32> to vector<1x32xf32>
    %c0_7 = arith.constant 0 : index
    %c0_8 = arith.constant 0 : index
    %c0_9 = arith.constant 0 : index
    %7 = vector.load %arg5[%c0_7, %c0_8, %c0_9] : memref<1x1x32xf32, #tpu.memory_space<vmem>>, vector<1x1x32xf32>
    %8 = vector.shape_cast %7 : vector<1x1x32xf32> to vector<1x32xf32>
    %cst = arith.constant dense<0.000000e+00> : vector<8xf32>
    %9 = vector.multi_reduction <add>, %3, %cst [1] : vector<8x32xf32> to vector<8xf32>
    %10 = vector.shape_cast %9 : vector<8xf32> to vector<8x1xf32>
    %cst_10 = arith.constant 3.200000e+01 : f32
    %11 = vector.broadcast %cst_10 : f32 to vector<8x1xf32>
    %12 = arith.divf %10, %11 : vector<8x1xf32>
    %13 = vector.broadcast %12 : vector<8x1xf32> to vector<8x32xf32>
    %14 = arith.subf %3, %13 : vector<8x32xf32>
    %15 = arith.mulf %14, %14 : vector<8x32xf32>
    %cst_11 = arith.constant dense<0.000000e+00> : vector<8xf32>
    %16 = vector.multi_reduction <add>, %15, %cst_11 [1] : vector<8x32xf32> to vector<8xf32>
    %17 = vector.shape_cast %16 : vector<8xf32> to vector<8x1xf32>
    %cst_12 = arith.constant 3.200000e+01 : f32
    %18 = vector.broadcast %cst_12 : f32 to vector<8x1xf32>
    %19 = arith.divf %17, %18 : vector<8x1xf32>
    %20 = vector.broadcast %12 : vector<8x1xf32> to vector<8x32xf32>
    %21 = arith.subf %3, %20 : vector<8x32xf32>
    %cst_13 = arith.constant 9.99999974E-6 : f32
    %22 = vector.broadcast %cst_13 : f32 to vector<8x1xf32>
    %23 = arith.addf %19, %22 : vector<8x1xf32>
    %24 = math.rsqrt %23 : vector<8x1xf32>
    %25 = vector.broadcast %24 : vector<8x1xf32> to vector<8x32xf32>
    %26 = arith.mulf %21, %25 : vector<8x32xf32>
    %27 = vector.broadcast %6 : vector<1x32xf32> to vector<8x32xf32>
    %28 = arith.mulf %26, %27 : vector<8x32xf32>
    %29 = vector.broadcast %8 : vector<1x32xf32> to vector<8x32xf32>
    %30 = arith.addf %28, %29 : vector<8x32xf32>
    %31 = arith.truncf %30 : vector<8x32xf32> to vector<8x32xbf16>
    %c0_14 = arith.constant 0 : index
    %c0_15 = arith.constant 0 : index
    %c0_16 = arith.constant 0 : index
    %32 = vector.load %arg6[%c0_14, %c0_15, %c0_16] : memref<1x32x96xbf16, #tpu.memory_space<vmem>>, vector<1x32x96xbf16>
    %33 = vector.shape_cast %32 : vector<1x32x96xbf16> to vector<32x96xbf16>
    %cst_17 = arith.constant dense<0.000000e+00> : vector<8x96xf32>
    %34 = tpu.matmul %31, %33, %cst_17 {dimension_numbers = #tpu.dot_dimension_numbers<[1], [0], [0], [1], [0, 0, 1, 1], [], []>} : vector<8x32xbf16>, vector<32x96xbf16>, vector<8x96xf32> -> vector<8x96xf32>
    %cst_18 = arith.constant 0.000000e+00 : f32
    %35 = vector.broadcast %cst_18 : f32 to vector<8x32xf32>
    %36 = vector.extract_strided_slice %34 {offsets = [0, 0], sizes = [8, 8], strides = [1, 1]} : vector<8x96xf32> to vector<8x8xf32>
    %37 = arith.truncf %36 : vector<8x8xf32> to vector<8x8xbf16>
    %38 = vector.extract_strided_slice %34 {offsets = [0, 32], sizes = [8, 8], strides = [1, 1]} : vector<8x96xf32> to vector<8x8xf32>
    %39 = arith.truncf %38 : vector<8x8xf32> to vector<8x8xbf16>
    %40 = vector.extract_strided_slice %34 {offsets = [0, 64], sizes = [8, 8], strides = [1, 1]} : vector<8x96xf32> to vector<8x8xf32>
    %41 = arith.truncf %40 : vector<8x8xf32> to vector<8x8xbf16>
    %cst_19 = arith.constant dense<0.000000e+00> : vector<8x8xf32>
    %42 = tpu.matmul %37, %39, %cst_19 {dimension_numbers = #tpu.dot_dimension_numbers<[1], [1], [0], [0], [0, 0, 1, 0], [], []>} : vector<8x8xbf16>, vector<8x8xbf16>, vector<8x8xf32> -> vector<8x8xf32>
    %cst_20 = arith.constant 0.353553385 : f32
    %43 = vector.broadcast %cst_20 : f32 to vector<8x8xf32>
    %44 = arith.mulf %42, %43 : vector<8x8xf32>
    %45 = arith.addf %44, %4 : vector<8x8xf32>
    %cst_21 = arith.constant dense<0xFF800000> : vector<8xf32>
    %46 = vector.multi_reduction <maximumf>, %45, %cst_21 [1] : vector<8x8xf32> to vector<8xf32>
    %47 = vector.shape_cast %46 : vector<8xf32> to vector<8x1xf32>
    %48 = vector.broadcast %47 : vector<8x1xf32> to vector<8x8xf32>
    %49 = arith.subf %45, %48 : vector<8x8xf32>
    %50 = math.exp %49 : vector<8x8xf32>
    %cst_22 = arith.constant dense<0.000000e+00> : vector<8xf32>
    %51 = vector.multi_reduction <add>, %50, %cst_22 [1] : vector<8x8xf32> to vector<8xf32>
    %52 = vector.shape_cast %51 : vector<8xf32> to vector<8x1xf32>
    %53 = tpu.reciprocal %52 {approx = true} : vector<8x1xf32> -> vector<8x1xf32>
    %54 = vector.broadcast %53 : vector<8x1xf32> to vector<8x8xf32>
    %55 = arith.mulf %50, %54 : vector<8x8xf32>
    %56 = arith.truncf %55 : vector<8x8xf32> to vector<8x8xbf16>
    %cst_23 = arith.constant dense<0.000000e+00> : vector<8x8xf32>
    %57 = tpu.matmul %56, %41, %cst_23 {dimension_numbers = #tpu.dot_dimension_numbers<[1], [0], [0], [1], [0, 0, 1, 1], [], []>} : vector<8x8xbf16>, vector<8x8xbf16>, vector<8x8xf32> -> vector<8x8xf32>
    %58 = arith.truncf %57 : vector<8x8xf32> to vector<8x8xbf16>
    %c0_24 = arith.constant 0 : index
    %c0_25 = arith.constant 0 : index
    %c0_26 = arith.constant 0 : index
    %c0_27 = arith.constant 0 : index
    %59 = vector.load %arg7[%c0_24, %c0_25, %c0_26, %c0_27] : memref<1x4x8x32xbf16, #tpu.memory_space<vmem>>, vector<1x1x8x32xbf16>
    %60 = vector.shape_cast %59 : vector<1x1x8x32xbf16> to vector<8x32xbf16>
    %cst_28 = arith.constant dense<0.000000e+00> : vector<8x32xf32>
    %61 = tpu.matmul %58, %60, %cst_28 {dimension_numbers = #tpu.dot_dimension_numbers<[1], [0], [0], [1], [0, 0, 1, 1], [], []>} : vector<8x8xbf16>, vector<8x32xbf16>, vector<8x32xf32> -> vector<8x32xf32>
    %62 = arith.addf %35, %61 : vector<8x32xf32>
    %63 = vector.extract_strided_slice %34 {offsets = [0, 8], sizes = [8, 8], strides = [1, 1]} : vector<8x96xf32> to vector<8x8xf32>
    %64 = arith.truncf %63 : vector<8x8xf32> to vector<8x8xbf16>
    %65 = vector.extract_strided_slice %34 {offsets = [0, 40], sizes = [8, 8], strides = [1, 1]} : vector<8x96xf32> to vector<8x8xf32>
    %66 = arith.truncf %65 : vector<8x8xf32> to vector<8x8xbf16>
    %67 = vector.extract_strided_slice %34 {offsets = [0, 72], sizes = [8, 8], strides = [1, 1]} : vector<8x96xf32> to vector<8x8xf32>
    %68 = arith.truncf %67 : vector<8x8xf32> to vector<8x8xbf16>
    %cst_29 = arith.constant dense<0.000000e+00> : vector<8x8xf32>
    %69 = tpu.matmul %64, %66, %cst_29 {dimension_numbers = #tpu.dot_dimension_numbers<[1], [1], [0], [0], [0, 0, 1, 0], [], []>} : vector<8x8xbf16>, vector<8x8xbf16>, vector<8x8xf32> -> vector<8x8xf32>
    %cst_30 = arith.constant 0.353553385 : f32
    %70 = vector.broadcast %cst_30 : f32 to vector<8x8xf32>
    %71 = arith.mulf %69, %70 : vector<8x8xf32>
    %72 = arith.addf %71, %4 : vector<8x8xf32>
    %cst_31 = arith.constant dense<0xFF800000> : vector<8xf32>
    %73 = vector.multi_reduction <maximumf>, %72, %cst_31 [1] : vector<8x8xf32> to vector<8xf32>
    %74 = vector.shape_cast %73 : vector<8xf32> to vector<8x1xf32>
    %75 = vector.broadcast %74 : vector<8x1xf32> to vector<8x8xf32>
    %76 = arith.subf %72, %75 : vector<8x8xf32>
    %77 = math.exp %76 : vector<8x8xf32>
    %cst_32 = arith.constant dense<0.000000e+00> : vector<8xf32>
    %78 = vector.multi_reduction <add>, %77, %cst_32 [1] : vector<8x8xf32> to vector<8xf32>
    %79 = vector.shape_cast %78 : vector<8xf32> to vector<8x1xf32>
    %80 = tpu.reciprocal %79 {approx = true} : vector<8x1xf32> -> vector<8x1xf32>
    %81 = vector.broadcast %80 : vector<8x1xf32> to vector<8x8xf32>
    %82 = arith.mulf %77, %81 : vector<8x8xf32>
    %83 = arith.truncf %82 : vector<8x8xf32> to vector<8x8xbf16>
    %cst_33 = arith.constant dense<0.000000e+00> : vector<8x8xf32>
    %84 = tpu.matmul %83, %68, %cst_33 {dimension_numbers = #tpu.dot_dimension_numbers<[1], [0], [0], [1], [0, 0, 1, 1], [], []>} : vector<8x8xbf16>, vector<8x8xbf16>, vector<8x8xf32> -> vector<8x8xf32>
    %85 = arith.truncf %84 : vector<8x8xf32> to vector<8x8xbf16>
    %c0_34 = arith.constant 0 : index
    %c1 = arith.constant 1 : index
    %c0_35 = arith.constant 0 : index
    %c0_36 = arith.constant 0 : index
    %86 = vector.load %arg7[%c0_34, %c1, %c0_35, %c0_36] : memref<1x4x8x32xbf16, #tpu.memory_space<vmem>>, vector<1x1x8x32xbf16>
    %87 = vector.shape_cast %86 : vector<1x1x8x32xbf16> to vector<8x32xbf16>
    %cst_37 = arith.constant dense<0.000000e+00> : vector<8x32xf32>
    %88 = tpu.matmul %85, %87, %cst_37 {dimension_numbers = #tpu.dot_dimension_numbers<[1], [0], [0], [1], [0, 0, 1, 1], [], []>} : vector<8x8xbf16>, vector<8x32xbf16>, vector<8x32xf32> -> vector<8x32xf32>
    %89 = arith.addf %62, %88 : vector<8x32xf32>
    %90 = vector.extract_strided_slice %34 {offsets = [0, 16], sizes = [8, 8], strides = [1, 1]} : vector<8x96xf32> to vector<8x8xf32>
    %91 = arith.truncf %90 : vector<8x8xf32> to vector<8x8xbf16>
    %92 = vector.extract_strided_slice %34 {offsets = [0, 48], sizes = [8, 8], strides = [1, 1]} : vector<8x96xf32> to vector<8x8xf32>
    %93 = arith.truncf %92 : vector<8x8xf32> to vector<8x8xbf16>
    %94 = vector.extract_strided_slice %34 {offsets = [0, 80], sizes = [8, 8], strides = [1, 1]} : vector<8x96xf32> to vector<8x8xf32>
    %95 = arith.truncf %94 : vector<8x8xf32> to vector<8x8xbf16>
    %cst_38 = arith.constant dense<0.000000e+00> : vector<8x8xf32>
    %96 = tpu.matmul %91, %93, %cst_38 {dimension_numbers = #tpu.dot_dimension_numbers<[1], [1], [0], [0], [0, 0, 1, 0], [], []>} : vector<8x8xbf16>, vector<8x8xbf16>, vector<8x8xf32> -> vector<8x8xf32>
    %cst_39 = arith.constant 0.353553385 : f32
    %97 = vector.broadcast %cst_39 : f32 to vector<8x8xf32>
    %98 = arith.mulf %96, %97 : vector<8x8xf32>
    %99 = arith.addf %98, %4 : vector<8x8xf32>
    %cst_40 = arith.constant dense<0xFF800000> : vector<8xf32>
    %100 = vector.multi_reduction <maximumf>, %99, %cst_40 [1] : vector<8x8xf32> to vector<8xf32>
    %101 = vector.shape_cast %100 : vector<8xf32> to vector<8x1xf32>
    %102 = vector.broadcast %101 : vector<8x1xf32> to vector<8x8xf32>
    %103 = arith.subf %99, %102 : vector<8x8xf32>
    %104 = math.exp %103 : vector<8x8xf32>
    %cst_41 = arith.constant dense<0.000000e+00> : vector<8xf32>
    %105 = vector.multi_reduction <add>, %104, %cst_41 [1] : vector<8x8xf32> to vector<8xf32>
    %106 = vector.shape_cast %105 : vector<8xf32> to vector<8x1xf32>
    %107 = tpu.reciprocal %106 {approx = true} : vector<8x1xf32> -> vector<8x1xf32>
    %108 = vector.broadcast %107 : vector<8x1xf32> to vector<8x8xf32>
    %109 = arith.mulf %104, %108 : vector<8x8xf32>
    %110 = arith.truncf %109 : vector<8x8xf32> to vector<8x8xbf16>
    %cst_42 = arith.constant dense<0.000000e+00> : vector<8x8xf32>
    %111 = tpu.matmul %110, %95, %cst_42 {dimension_numbers = #tpu.dot_dimension_numbers<[1], [0], [0], [1], [0, 0, 1, 1], [], []>} : vector<8x8xbf16>, vector<8x8xbf16>, vector<8x8xf32> -> vector<8x8xf32>
    %112 = arith.truncf %111 : vector<8x8xf32> to vector<8x8xbf16>
    %c0_43 = arith.constant 0 : index
    %c2 = arith.constant 2 : index
    %c0_44 = arith.constant 0 : index
    %c0_45 = arith.constant 0 : index
    %113 = vector.load %arg7[%c0_43, %c2, %c0_44, %c0_45] : memref<1x4x8x32xbf16, #tpu.memory_space<vmem>>, vector<1x1x8x32xbf16>
    %114 = vector.shape_cast %113 : vector<1x1x8x32xbf16> to vector<8x32xbf16>
    %cst_46 = arith.constant dense<0.000000e+00> : vector<8x32xf32>
    %115 = tpu.matmul %112, %114, %cst_46 {dimension_numbers = #tpu.dot_dimension_numbers<[1], [0], [0], [1], [0, 0, 1, 1], [], []>} : vector<8x8xbf16>, vector<8x32xbf16>, vector<8x32xf32> -> vector<8x32xf32>
    %116 = arith.addf %89, %115 : vector<8x32xf32>
    %117 = vector.extract_strided_slice %34 {offsets = [0, 24], sizes = [8, 8], strides = [1, 1]} : vector<8x96xf32> to vector<8x8xf32>
    %118 = arith.truncf %117 : vector<8x8xf32> to vector<8x8xbf16>
    %119 = vector.extract_strided_slice %34 {offsets = [0, 56], sizes = [8, 8], strides = [1, 1]} : vector<8x96xf32> to vector<8x8xf32>
    %120 = arith.truncf %119 : vector<8x8xf32> to vector<8x8xbf16>
    %121 = vector.extract_strided_slice %34 {offsets = [0, 88], sizes = [8, 8], strides = [1, 1]} : vector<8x96xf32> to vector<8x8xf32>
    %122 = arith.truncf %121 : vector<8x8xf32> to vector<8x8xbf16>
    %cst_47 = arith.constant dense<0.000000e+00> : vector<8x8xf32>
    %123 = tpu.matmul %118, %120, %cst_47 {dimension_numbers = #tpu.dot_dimension_numbers<[1], [1], [0], [0], [0, 0, 1, 0], [], []>} : vector<8x8xbf16>, vector<8x8xbf16>, vector<8x8xf32> -> vector<8x8xf32>
    %cst_48 = arith.constant 0.353553385 : f32
    %124 = vector.broadcast %cst_48 : f32 to vector<8x8xf32>
    %125 = arith.mulf %123, %124 : vector<8x8xf32>
    %126 = arith.addf %125, %4 : vector<8x8xf32>
    %cst_49 = arith.constant dense<0xFF800000> : vector<8xf32>
    %127 = vector.multi_reduction <maximumf>, %126, %cst_49 [1] : vector<8x8xf32> to vector<8xf32>
    %128 = vector.shape_cast %127 : vector<8xf32> to vector<8x1xf32>
    %129 = vector.broadcast %128 : vector<8x1xf32> to vector<8x8xf32>
    %130 = arith.subf %126, %129 : vector<8x8xf32>
    %131 = math.exp %130 : vector<8x8xf32>
    %cst_50 = arith.constant dense<0.000000e+00> : vector<8xf32>
    %132 = vector.multi_reduction <add>, %131, %cst_50 [1] : vector<8x8xf32> to vector<8xf32>
    %133 = vector.shape_cast %132 : vector<8xf32> to vector<8x1xf32>
    %134 = tpu.reciprocal %133 {approx = true} : vector<8x1xf32> -> vector<8x1xf32>
    %135 = vector.broadcast %134 : vector<8x1xf32> to vector<8x8xf32>
    %136 = arith.mulf %131, %135 : vector<8x8xf32>
    %137 = arith.truncf %136 : vector<8x8xf32> to vector<8x8xbf16>
    %cst_51 = arith.constant dense<0.000000e+00> : vector<8x8xf32>
    %138 = tpu.matmul %137, %122, %cst_51 {dimension_numbers = #tpu.dot_dimension_numbers<[1], [0], [0], [1], [0, 0, 1, 1], [], []>} : vector<8x8xbf16>, vector<8x8xbf16>, vector<8x8xf32> -> vector<8x8xf32>
    %139 = arith.truncf %138 : vector<8x8xf32> to vector<8x8xbf16>
    %c0_52 = arith.constant 0 : index
    %c3 = arith.constant 3 : index
    %c0_53 = arith.constant 0 : index
    %c0_54 = arith.constant 0 : index
    %140 = vector.load %arg7[%c0_52, %c3, %c0_53, %c0_54] : memref<1x4x8x32xbf16, #tpu.memory_space<vmem>>, vector<1x1x8x32xbf16>
    %141 = vector.shape_cast %140 : vector<1x1x8x32xbf16> to vector<8x32xbf16>
    %cst_55 = arith.constant dense<0.000000e+00> : vector<8x32xf32>
    %142 = tpu.matmul %139, %141, %cst_55 {dimension_numbers = #tpu.dot_dimension_numbers<[1], [0], [0], [1], [0, 0, 1, 1], [], []>} : vector<8x8xbf16>, vector<8x32xbf16>, vector<8x32xf32> -> vector<8x32xf32>
    %143 = arith.addf %116, %142 : vector<8x32xf32>
    %144 = arith.addf %3, %143 : vector<8x32xf32>
    %c0_56 = arith.constant 0 : index
    %c0_57 = arith.constant 0 : index
    %c0_58 = arith.constant 0 : index
    %145 = vector.load %arg8[%c0_56, %c0_57, %c0_58] : memref<1x1x32xf32, #tpu.memory_space<vmem>>, vector<1x1x32xf32>
    %146 = vector.shape_cast %145 : vector<1x1x32xf32> to vector<1x32xf32>
    %147 = vector.broadcast %146 : vector<1x32xf32> to vector<8x32xf32>
    %148 = arith.addf %144, %147 : vector<8x32xf32>
    %c0_59 = arith.constant 0 : index
    %c0_60 = arith.constant 0 : index
    %c0_61 = arith.constant 0 : index
    %149 = vector.load %arg9[%c0_59, %c0_60, %c0_61] : memref<1x1x32xf32, #tpu.memory_space<vmem>>, vector<1x1x32xf32>
    %150 = vector.shape_cast %149 : vector<1x1x32xf32> to vector<1x32xf32>
    %c0_62 = arith.constant 0 : index
    %c0_63 = arith.constant 0 : index
    %c0_64 = arith.constant 0 : index
    %151 = vector.load %arg10[%c0_62, %c0_63, %c0_64] : memref<1x1x32xf32, #tpu.memory_space<vmem>>, vector<1x1x32xf32>
    %152 = vector.shape_cast %151 : vector<1x1x32xf32> to vector<1x32xf32>
    %cst_65 = arith.constant dense<0.000000e+00> : vector<8xf32>
    %153 = vector.multi_reduction <add>, %148, %cst_65 [1] : vector<8x32xf32> to vector<8xf32>
    %154 = vector.shape_cast %153 : vector<8xf32> to vector<8x1xf32>
    %cst_66 = arith.constant 3.200000e+01 : f32
    %155 = vector.broadcast %cst_66 : f32 to vector<8x1xf32>
    %156 = arith.divf %154, %155 : vector<8x1xf32>
    %157 = vector.broadcast %156 : vector<8x1xf32> to vector<8x32xf32>
    %158 = arith.subf %148, %157 : vector<8x32xf32>
    %159 = arith.mulf %158, %158 : vector<8x32xf32>
    %cst_67 = arith.constant dense<0.000000e+00> : vector<8xf32>
    %160 = vector.multi_reduction <add>, %159, %cst_67 [1] : vector<8x32xf32> to vector<8xf32>
    %161 = vector.shape_cast %160 : vector<8xf32> to vector<8x1xf32>
    %cst_68 = arith.constant 3.200000e+01 : f32
    %162 = vector.broadcast %cst_68 : f32 to vector<8x1xf32>
    %163 = arith.divf %161, %162 : vector<8x1xf32>
    %164 = vector.broadcast %156 : vector<8x1xf32> to vector<8x32xf32>
    %165 = arith.subf %148, %164 : vector<8x32xf32>
    %cst_69 = arith.constant 9.99999974E-6 : f32
    %166 = vector.broadcast %cst_69 : f32 to vector<8x1xf32>
    %167 = arith.addf %163, %166 : vector<8x1xf32>
    %168 = math.rsqrt %167 : vector<8x1xf32>
    %169 = vector.broadcast %168 : vector<8x1xf32> to vector<8x32xf32>
    %170 = arith.mulf %165, %169 : vector<8x32xf32>
    %171 = vector.broadcast %150 : vector<1x32xf32> to vector<8x32xf32>
    %172 = arith.mulf %170, %171 : vector<8x32xf32>
    %173 = vector.broadcast %152 : vector<1x32xf32> to vector<8x32xf32>
    %174 = arith.addf %172, %173 : vector<8x32xf32>
    %175 = arith.truncf %174 : vector<8x32xf32> to vector<8x32xbf16>
    %c0_70 = arith.constant 0 : index
    %c0_71 = arith.constant 0 : index
    %c0_72 = arith.constant 0 : index
    %176 = vector.load %arg11[%c0_70, %c0_71, %c0_72] : memref<1x32x128xbf16, #tpu.memory_space<vmem>>, vector<1x32x128xbf16>
    %177 = vector.shape_cast %176 : vector<1x32x128xbf16> to vector<32x128xbf16>
    %cst_73 = arith.constant dense<0.000000e+00> : vector<8x128xf32>
    %178 = tpu.matmul %175, %177, %cst_73 {dimension_numbers = #tpu.dot_dimension_numbers<[1], [0], [0], [1], [0, 0, 1, 1], [], []>} : vector<8x32xbf16>, vector<32x128xbf16>, vector<8x128xf32> -> vector<8x128xf32>
    %c0_74 = arith.constant 0 : index
    %c0_75 = arith.constant 0 : index
    %c0_76 = arith.constant 0 : index
    %179 = vector.load %arg12[%c0_74, %c0_75, %c0_76] : memref<1x1x128xf32, #tpu.memory_space<vmem>>, vector<1x1x128xf32>
    %180 = vector.shape_cast %179 : vector<1x1x128xf32> to vector<1x128xf32>
    %181 = vector.broadcast %180 : vector<1x128xf32> to vector<8x128xf32>
    %182 = arith.addf %178, %181 : vector<8x128xf32>
    %cst_77 = arith.constant 0.000000e+00 : f32
    %183 = vector.broadcast %cst_77 : f32 to vector<8x128xf32>
    %184 = arith.maximumf %182, %183 : vector<8x128xf32>
    %185 = arith.truncf %184 : vector<8x128xf32> to vector<8x128xbf16>
    %c0_78 = arith.constant 0 : index
    %c0_79 = arith.constant 0 : index
    %c0_80 = arith.constant 0 : index
    %186 = vector.load %arg13[%c0_78, %c0_79, %c0_80] : memref<1x128x32xbf16, #tpu.memory_space<vmem>>, vector<1x128x32xbf16>
    %187 = vector.shape_cast %186 : vector<1x128x32xbf16> to vector<128x32xbf16>
    %cst_81 = arith.constant dense<0.000000e+00> : vector<8x32xf32>
    %188 = tpu.matmul %185, %187, %cst_81 {dimension_numbers = #tpu.dot_dimension_numbers<[1], [0], [0], [1], [0, 0, 1, 1], [], []>} : vector<8x128xbf16>, vector<128x32xbf16>, vector<8x32xf32> -> vector<8x32xf32>
    %c0_82 = arith.constant 0 : index
    %c0_83 = arith.constant 0 : index
    %c0_84 = arith.constant 0 : index
    %189 = vector.load %arg14[%c0_82, %c0_83, %c0_84] : memref<1x1x32xf32, #tpu.memory_space<vmem>>, vector<1x1x32xf32>
    %190 = vector.shape_cast %189 : vector<1x1x32xf32> to vector<1x32xf32>
    %191 = vector.broadcast %190 : vector<1x32xf32> to vector<8x32xf32>
    %192 = arith.addf %188, %191 : vector<8x32xf32>
    %193 = arith.addf %148, %192 : vector<8x32xf32>
    %c0_85 = arith.constant 0 : index
    %c0_86 = arith.constant 0 : index
    %194 = vector.load %arg20[%c0_85, %c0_86] : memref<8x32xf32, #tpu.memory_space<vmem>>, vector<8x32xf32>
    tpu.vector_store %arg20[%c0_85, %c0_86], %193 {strides = array<i32>} : memref<8x32xf32, #tpu.memory_space<vmem>>, vector<8x32xf32>,
    %c1_i32 = arith.constant 1 : i32
    %195 = arith.cmpi eq, %arg1, %c1_i32 : i32
    %196 = arith.extui %195 : i1 to i32
    %c0_i32_87 = arith.constant 0 : i32
    %197 = arith.cmpi ne, %196, %c0_i32_87 : i32
    scf.if %197 {
      %c0_88 = arith.constant 0 : index
      %c0_89 = arith.constant 0 : index
      %198 = vector.load %arg15[%c0_88, %c0_89] : memref<1x32xf32, #tpu.memory_space<vmem>>, vector<1x32xf32>
      %c0_90 = arith.constant 0 : index
      %c0_91 = arith.constant 0 : index
      %199 = vector.load %arg16[%c0_90, %c0_91] : memref<1x32xf32, #tpu.memory_space<vmem>>, vector<1x32xf32>
      %cst_92 = arith.constant dense<0.000000e+00> : vector<8xf32>
      %200 = vector.multi_reduction <add>, %193, %cst_92 [1] : vector<8x32xf32> to vector<8xf32>
      %201 = vector.shape_cast %200 : vector<8xf32> to vector<8x1xf32>
      %cst_93 = arith.constant 3.200000e+01 : f32
      %202 = vector.broadcast %cst_93 : f32 to vector<8x1xf32>
      %203 = arith.divf %201, %202 : vector<8x1xf32>
      %204 = vector.broadcast %203 : vector<8x1xf32> to vector<8x32xf32>
      %205 = arith.subf %193, %204 : vector<8x32xf32>
      %206 = arith.mulf %205, %205 : vector<8x32xf32>
      %cst_94 = arith.constant dense<0.000000e+00> : vector<8xf32>
      %207 = vector.multi_reduction <add>, %206, %cst_94 [1] : vector<8x32xf32> to vector<8xf32>
      %208 = vector.shape_cast %207 : vector<8xf32> to vector<8x1xf32>
      %cst_95 = arith.constant 3.200000e+01 : f32
      %209 = vector.broadcast %cst_95 : f32 to vector<8x1xf32>
      %210 = arith.divf %208, %209 : vector<8x1xf32>
      %211 = vector.broadcast %203 : vector<8x1xf32> to vector<8x32xf32>
      %212 = arith.subf %193, %211 : vector<8x32xf32>
      %cst_96 = arith.constant 9.99999974E-6 : f32
      %213 = vector.broadcast %cst_96 : f32 to vector<8x1xf32>
      %214 = arith.addf %210, %213 : vector<8x1xf32>
      %215 = math.rsqrt %214 : vector<8x1xf32>
      %216 = vector.broadcast %215 : vector<8x1xf32> to vector<8x32xf32>
      %217 = arith.mulf %212, %216 : vector<8x32xf32>
      %218 = vector.broadcast %198 : vector<1x32xf32> to vector<8x32xf32>
      %219 = arith.mulf %217, %218 : vector<8x32xf32>
      %220 = vector.broadcast %199 : vector<1x32xf32> to vector<8x32xf32>
      %221 = arith.addf %219, %220 : vector<8x32xf32>
      %222 = arith.truncf %221 : vector<8x32xf32> to vector<8x32xbf16>
      %c0_97 = arith.constant 0 : index
      %c0_98 = arith.constant 0 : index
      %223 = vector.load %arg17[%c0_97, %c0_98] : memref<32x128xbf16, #tpu.memory_space<vmem>>, vector<32x128xbf16>
      %cst_99 = arith.constant dense<0.000000e+00> : vector<8x128xf32>
      %224 = tpu.matmul %222, %223, %cst_99 {dimension_numbers = #tpu.dot_dimension_numbers<[1], [0], [0], [1], [0, 0, 1, 1], [], []>} : vector<8x32xbf16>, vector<32x128xbf16>, vector<8x128xf32> -> vector<8x128xf32>
      %c0_100 = arith.constant 0 : index
      %c0_101 = arith.constant 0 : index
      %225 = vector.load %arg18[%c0_100, %c0_101] : memref<1x128xf32, #tpu.memory_space<vmem>>, vector<1x128xf32>
      %226 = vector.broadcast %225 : vector<1x128xf32> to vector<8x128xf32>
      %227 = arith.addf %224, %226 : vector<8x128xf32>
      %c0_102 = arith.constant 0 : index
      %c0_103 = arith.constant 0 : index
      %c0_104 = arith.constant 0 : index
      %228 = vector.load %arg19[%c0_102, %c0_103, %c0_104] : memref<1x8x128xf32, #tpu.memory_space<vmem>>, vector<1x8x128xf32>
      %229 = vector.shape_cast %228 : vector<1x8x128xf32> to vector<8x128xf32>
      %230 = vector.shape_cast %227 : vector<8x128xf32> to vector<1x8x128xf32>
      tpu.vector_store %arg19[%c0_102, %c0_103, %c0_104], %230 {strides = array<i32>} : memref<1x8x128xf32, #tpu.memory_space<vmem>>, vector<1x8x128xf32>,
    } else {
    }
    return
  }
  func.func @transform_0(%arg0: i32, %arg1: i32) -> (i32, i32) {
    %c0_i32 = arith.constant 0 : i32
    %c0_i32_0 = arith.constant 0 : i32
    %c0_i32_1 = arith.constant 0 : i32
    return %c0_i32, %c0_i32_0 : i32, i32
  }
  func.func @transform_1(%arg0: i32, %arg1: i32) -> (i32, i32, i32) {
    %c0_i32 = arith.constant 0 : i32
    %c0_i32_0 = arith.constant 0 : i32
    %c0_i32_1 = arith.constant 0 : i32
    return %arg0, %c0_i32, %c0_i32_0 : i32, i32, i32
  }
  func.func @transform_2(%arg0: i32, %arg1: i32) -> (i32, i32, i32) {
    %c0_i32 = arith.constant 0 : i32
    %c0_i32_0 = arith.constant 0 : i32
    %c0_i32_1 = arith.constant 0 : i32
    return %arg1, %c0_i32, %c0_i32_0 : i32, i32, i32
  }
  func.func @transform_3(%arg0: i32, %arg1: i32) -> (i32, i32, i32) {
    %c0_i32 = arith.constant 0 : i32
    %c0_i32_0 = arith.constant 0 : i32
    %c0_i32_1 = arith.constant 0 : i32
    return %arg1, %c0_i32, %c0_i32_0 : i32, i32, i32
  }
  func.func @transform_4(%arg0: i32, %arg1: i32) -> (i32, i32, i32) {
    %c0_i32 = arith.constant 0 : i32
    %c0_i32_0 = arith.constant 0 : i32
    %c0_i32_1 = arith.constant 0 : i32
    return %arg1, %c0_i32, %c0_i32_0 : i32, i32, i32
  }
  func.func @transform_5(%arg0: i32, %arg1: i32) -> (i32, i32, i32, i32) {
    %c0_i32 = arith.constant 0 : i32
    %c0_i32_0 = arith.constant 0 : i32
    %c0_i32_1 = arith.constant 0 : i32
    %c0_i32_2 = arith.constant 0 : i32
    return %arg1, %c0_i32, %c0_i32_0, %c0_i32_1 : i32, i32, i32, i32
  }
  func.func @transform_6(%arg0: i32, %arg1: i32) -> (i32, i32, i32) {
    %c0_i32 = arith.constant 0 : i32
    %c0_i32_0 = arith.constant 0 : i32
    %c0_i32_1 = arith.constant 0 : i32
    return %arg1, %c0_i32, %c0_i32_0 : i32, i32, i32
  }
  func.func @transform_7(%arg0: i32, %arg1: i32) -> (i32, i32, i32) {
    %c0_i32 = arith.constant 0 : i32
    %c0_i32_0 = arith.constant 0 : i32
    %c0_i32_1 = arith.constant 0 : i32
    return %arg1, %c0_i32, %c0_i32_0 : i32, i32, i32
  }
  func.func @transform_8(%arg0: i32, %arg1: i32) -> (i32, i32, i32) {
    %c0_i32 = arith.constant 0 : i32
    %c0_i32_0 = arith.constant 0 : i32
    %c0_i32_1 = arith.constant 0 : i32
    return %arg1, %c0_i32, %c0_i32_0 : i32, i32, i32
  }
  func.func @transform_9(%arg0: i32, %arg1: i32) -> (i32, i32, i32) {
    %c0_i32 = arith.constant 0 : i32
    %c0_i32_0 = arith.constant 0 : i32
    %c0_i32_1 = arith.constant 0 : i32
    return %arg1, %c0_i32, %c0_i32_0 : i32, i32, i32
  }
  func.func @transform_10(%arg0: i32, %arg1: i32) -> (i32, i32, i32) {
    %c0_i32 = arith.constant 0 : i32
    %c0_i32_0 = arith.constant 0 : i32
    %c0_i32_1 = arith.constant 0 : i32
    return %arg1, %c0_i32, %c0_i32_0 : i32, i32, i32
  }
  func.func @transform_11(%arg0: i32, %arg1: i32) -> (i32, i32, i32) {
    %c0_i32 = arith.constant 0 : i32
    %c0_i32_0 = arith.constant 0 : i32
    %c0_i32_1 = arith.constant 0 : i32
    return %arg1, %c0_i32, %c0_i32_0 : i32, i32, i32
  }
  func.func @transform_12(%arg0: i32, %arg1: i32) -> (i32, i32, i32) {
    %c0_i32 = arith.constant 0 : i32
    %c0_i32_0 = arith.constant 0 : i32
    %c0_i32_1 = arith.constant 0 : i32
    return %arg1, %c0_i32, %c0_i32_0 : i32, i32, i32
  }
  func.func @transform_13(%arg0: i32, %arg1: i32) -> (i32, i32) {
    %c0_i32 = arith.constant 0 : i32
    %c0_i32_0 = arith.constant 0 : i32
    %c0_i32_1 = arith.constant 0 : i32
    return %c0_i32, %c0_i32_0 : i32, i32
  }
  func.func @transform_14(%arg0: i32, %arg1: i32) -> (i32, i32) {
    %c0_i32 = arith.constant 0 : i32
    %c0_i32_0 = arith.constant 0 : i32
    %c0_i32_1 = arith.constant 0 : i32
    return %c0_i32, %c0_i32_0 : i32, i32
  }
  func.func @transform_15(%arg0: i32, %arg1: i32) -> (i32, i32) {
    %c0_i32 = arith.constant 0 : i32
    %c0_i32_0 = arith.constant 0 : i32
    %c0_i32_1 = arith.constant 0 : i32
    return %c0_i32, %c0_i32_0 : i32, i32
  }
  func.func @transform_16(%arg0: i32, %arg1: i32) -> (i32, i32) {
    %c0_i32 = arith.constant 0 : i32
    %c0_i32_0 = arith.constant 0 : i32
    %c0_i32_1 = arith.constant 0 : i32
    return %c0_i32, %c0_i32_0 : i32, i32
  }
  func.func @transform_17(%arg0: i32, %arg1: i32) -> (i32, i32, i32) {
    %c0_i32 = arith.constant 0 : i32
    %c0_i32_0 = arith.constant 0 : i32
    %c0_i32_1 = arith.constant 0 : i32
    return %arg0, %c0_i32, %c0_i32_0 : i32, i32, i32
  }
}

</mosaic_0001>

<bundles_post_ra>
// kernel: tpu_custom_call.1
= control target key start
LH: loop header
LB: loop body
LE: loop exit
PB: predicated region body
PF: predicated region fallthrough
CT: control target
= control target key end

     0   :  { %s2932_s0 = inlined_call_operand.vmem [shape: f32[8,8], index: 0, kind: input, shape index: {}]   ;;  %s2933_s1 = inlined_call_operand.vmem [shape: f32[2,8,32], index: 1, kind: input, shape index: {}]   ;;  %s2934_s2 = inlined_call_operand.vmem [shape: f32[2,1,32], index: 2, kind: input, shape index: {}]   ;;  %s2935_s3 = inlined_call_operand.vmem [shape: f32[2,1,32], index: 3, kind: input, shape index: {}]   ;;  %s2936_s4 = inlined_call_operand.vmem [shape: bf16[2,32,96], index: 4, kind: input, shape index: {}]   ;;  %s2937_s5 = inlined_call_operand.vmem [shape: bf16[2,4,8,32], index: 5, kind: input, shape index: {}]   ;;  %s2938_s6 = inlined_call_operand.vmem [shape: f32[2,1,32], index: 6, kind: input, shape index: {}]   ;;  %s2939_s7 = inlined_call_operand.vmem [shape: f32[2,1,32], index: 7, kind: input, shape index: {}]   ;;  %s2940_s8 = inlined_call_operand.vmem [shape: f32[2,1,32], index: 8, kind: input, shape index: {}]   ;;  %s2941_s9 = inlined_call_operand.vmem [shape: bf16[2,32,128], index: 9, kind: input, shape index: {}]   ;;  %s2942_s10 = inlined_call_operand.vmem [shape: f32[2,1,128], index: 10, kind: input, shape index: {}]   ;;  %s2943_s11 = inlined_call_operand.vmem [shape: bf16[2,128,32], index: 11, kind: input, shape index: {}]   ;;  %s2944_s12 = inlined_call_operand.vmem [shape: f32[2,1,32], index: 12, kind: input, shape index: {}]   ;;  %s2945_s13 = inlined_call_operand.vmem [shape: f32[1,32], index: 13, kind: input, shape index: {}]   ;;  %s2946_s14 = inlined_call_operand.vmem [shape: f32[1,32], index: 14, kind: input, shape index: {}]   ;;  %s2947_s15 = inlined_call_operand.vmem [shape: bf16[32,128], index: 15, kind: input, shape index: {}]   ;;  %s2948_s16 = inlined_call_operand.vmem [shape: f32[1,128], index: 16, kind: input, shape index: {}]   ;;  %s2949_s17 = inlined_call_operand.hbm [shape: f32[2,8,128], index: 17, kind: output, shape index: {}]  }
   0x1   :  { %2966 = sst [smem:[#allocation19_spill]] %s2932_s0 }
   0x2   :  { %2967 = sst [smem:[#allocation20_spill]] %s2933_s1 }
   0x3   :  { %2968 = sst [smem:[#allocation21_spill]] %s2936_s4 }
   0x4   :  { %2969 = sst [smem:[#allocation22_spill]] %s2937_s5 }
   0x5   :  { %2970 = sst [smem:[#allocation23_spill]] %s2945_s13 }
   0x6   :  { %2971 = sst [smem:[#allocation24_spill]] %s2946_s14 }
   0x7   :  { %2972 = sst [smem:[#allocation25_spill]] %s2947_s15 }
   0x8   :  { %2973 = sst [smem:[#allocation26_spill]] %s2948_s16 }
   0x9   :  { %2974 = sst [smem:[#allocation27_spill]] %s2949_s17 }
   0xa   :  { %22 = vsyncpa [#allocation4], 0 }
   0xb   :  { %24 = vsyncpa [#allocation4 + $0x1], 0  ;;  %s2545_s24 = smov 0   ;;  %s2547_s25 = smov 0  }
   0xc   :  { %s2549_s26 = smov 0   ;;  %s2551_s27 = smov 0  }
   0xd   :  { %s2553_s28 = smov 0   ;;  %s2555_s29 = smov 0  }
   0xe   :  { %s2557_s0 = smov 0   ;;  %s2559_s30 = smov 0  }
   0xf LB: > { %2975 = sst [smem:[#allocation6_spill]] %s2409_s24  ;;  %s1998_s18 = sadd.s32 4294967295, %s2437_s30   ;;  %s2437_s30 = sphi %s2559_s30, %s30_s30   ;;  %s2433_s0 = sphi %s2557_s0, %s3019_s0   ;;  %s2429_s29 = sphi %s2555_s29, %s3018_s29   ;;  %s2425_s28 = sphi %s2553_s28, %s3017_s28   ;;  %s2421_s27 = sphi %s2551_s27, %s3016_s27   ;;  %s2417_s26 = sphi %s2549_s26, %s3015_s26   ;;  %s2413_s25 = sphi %s2547_s25, %s3014_s25   ;;  %s2409_s24 = sphi %s2545_s24, %s3013_s24  }
  0x10   : > { %2976 = sst [smem:[#allocation7_spill]] %s2413_s25  ;;  %s1999_s19 = sadd.s32 4294967294, %s2437_s30  }
  0x11   : > { %2977 = sst [smem:[#allocation8_spill]] %s2417_s26  ;;  %s39_s1 = sadd.s32 1, %s2429_s29 }
  0x12   : > { %2978 = sst [smem:[#allocation9_spill]] %s2421_s27  ;;  %p40_p0 = scmp.ge.s32.totalorder %s39_s1, 2 }
  0x13   : > { %2979 = sst [smem:[#allocation10_spill]] %s2425_s28  ;;  %s42_s20 = sadd.s32 1, %s2433_s0 }
  0x14   : > { %2980 = sst [smem:[#allocation11_spill]] %s2429_s29  ;;  %p476_p1 = scmp.ne.s32.totalorder %s2417_s26, %s2413_s25 }
  0x15   : > { %2981 = sst [smem:[#allocation12_spill]] %s2433_s0  ;;  %p477_p2 = scmp.eq.s32.totalorder %s1998_s18, 3 }
  0x16   : > { %2982 = sst [smem:[#allocation13_spill]] %s2437_s30  ;;  %s3021_s1 = smov (%p40_p0, %s39_s1), 0 }
  0x17   : > { %2983 = sst [smem:[#allocation14_spill]] %s3021_s1  ;;  %s3023_s20 = smov (!%p40_p0, %s42_s20), %s2433_s0 }
  0x18   : > { %p2594_p3 = por %p477_p2, %p476_p1  ;;  %p482_p4 = scmp.ne.s32.totalorder %s2413_s25, %s2409_s24 }
  0x19   : > { %p44_p5 = scmp.ge.s32.totalorder %s3023_s20, 2  ;;  %p483_p6 = scmp.eq.s32.totalorder %s1999_s19, 3 }
  0x1a   : > { %s2984_s21 = scalar_select %p2594_p3, 1, 0 }
  0x1b   : > { %p2002_p7 = scmp.ge.s32.totalorder %s2437_s30, 1  ;;  %p597_p8 = scmp.lt.s32.totalorder %s2437_s30, 5 }
  0x1c   : > { %2985 = sst [smem:[#allocation15_spill]] %s2984_s21  ;;  %s3025_s20 = smov (%p44_p5, %s3023_s20), 0 }
  0x1d   : > { %2986 = sst [smem:[#allocation16_spill]] %s3025_s20  ;;  %p2604_p9 = por %p483_p6, %p482_p4 }
  0x1e   : > { %p598_p10 = pnand %p2002_p7, %p597_p8  ;;  %s463_s23 = ssub.s32 %s2433_s0, %s3025_s20 }
  0x1f   : > { %s2987_s22 = scalar_select %p2604_p9, 1, 0 }
  0x20   : > { %s466_s18 = sadd.s32 1, %s2417_s26  ;;  %p464_p11 = scmp.eq.s32.totalorder %s463_s23, 0 }
  0x21   : > { %2988 = sst [smem:[#allocation17_spill]] %s2987_s22  ;;  %601 = sbr.rel (%p598_p10) target bundleno = 4593 (0x11f1), region = 88 }
  0x22   : > { %s2612_s1 = scalar_select %p464_p11, %s2417_s26, %s466_s18  }
  0x23   : > { %s2955_s19 = sand.u32 (!%p598_p10), 1, %s2413_s25   ;;  %p689_p12 = scmp.lt.s32.totalorder (!%p598_p10), %s2425_s28, 1 }
  0x24   : > { %2989 = sst [smem:[#allocation18_spill]] %s2612_s1  ;;  %s2618_s29 = sshll.u32 (!%p598_p10), %s2955_s19, 3 }
  0x25   : > { %p693_p13 = scmp.lt.s32.totalorder (!%p598_p10), %s2421_s27, 1  ;;  %s2990_s0 = sld [smem:[#allocation20_spill]] (!%p598_p10) }
  0x26   : > { %s690_s22 = scalar_select %p689_p12, %s2425_s28, 1 }
  0x27   : > { %s2623_s24 = scalar_select %p693_p13, %s2421_s27, 1 }
  0x28   : > { %s2004_s23 = sshll.u32 %s690_s22, 3  ;;  %s2991_s4 = sld [smem:[#allocation21_spill]] }
  0x29   : > { %s2061_s28 = sshll.u32 %s2623_s24, 4  ;;  %s2992_s5 = sld [smem:[#allocation22_spill]] }
  0x2a   : > { %s714_s17 = scalar_lea.vmem %s2939_s7, %s2623_s24  ;;  %s2662_s30 = scalar_lea.vmem %s2941_s9, %s2061_s28 }
  0x2b   : > { %s692_s19 = scalar_lea.vmem %s2990_s0, %s2004_s23  ;;  %s733_s21 = scalar_lea.vmem %s2944_s12, %s2623_s24 }
  0x2c   : > { %s688_s18 = scalar_lea.vmem [#allocation3], %s2618_s29  ;;  %s2993_s25 = sld [smem:[#allocation9_spill]] }
  0x2e   : > { %s2640_s13 = scalar_lea.vmem %s2991_s4, %s2061_s28  ;;  %s725_s4 = scalar_lea.vmem %s2942_s10, %s2623_s24 }
  0x2f   : > { %s2645_s27 = scalar_lea.vmem %s2992_s5, %s2061_s28  ;;  %s2064_s5 = sshll.u32 %s2623_s24, 6 }
  0x30   : > { %s2672_s26 = scalar_lea.vmem %s2943_s11, %s2064_s5 }
  0x32   : > { %p2013_p0 = scmp.ne.s32.totalorder %s2993_s25, 0 }
  0x34   : > { %738 = sbr.rel (%p2013_p0) target bundleno = 59 (0x3b), region = 92 }
  0x39   : > { %v739_v0 = vld [vmem:[%s692_s19] sm:$0xff]  ;;  %vm740_vm0 = vcmask 261120  }
  0x3a   : > { %741 = vst.msk [vmem:[#allocation2] sm:$0xff] %vm740_vm0, %v739_v0 }
  0x3b PF: > { %vm746_vm1 = vcmask 261120   ;;  %v2309_v8 = vld [vmem:[%s2640_s13 + $0x8] sm:$0xff]   ;;  %v2439_v9 = vmov 0.0   ;;  %vm2440_vm2 = vmmov 0   ;;  %v2310_v10 = vld [vmem:[%s2640_s13] sm:$0xff]   ;;  %s2994_s28 = scalar_lea.vmem %s2934_s2, %s2623_s24  ;;  %s2995_s14 = scalar_lea.vmem %s2935_s3, %s2623_s24  ;;  %vm839_vm3 = vcmask 64512  }
  0x3c   : > { %2107 = vmatprep.subr.bf16.mxu1 %v2439_v9  ;;  %2111 = vmatprep.mubr.msk.bf16.mxu1 %vm2440_vm2, %v2439_v9  ;;  %v2014_v15 = vld [vmem:[%s2994_s28] ss:$0 sm:$0xff]  ;;  %s2441_s16 = smov 64   ;;  %s2442_s15 = smov 96   ;;  %vm905_vm4 = vcmask 1043456  }
  0x3d   : > { %2108 = vmatpush3.bf16.msra.mxu1 %v2309_v8  ;;  %2133 = vmatprep.subr.bf16.mxu0 %v2439_v9  ;;  %v2015_v17 = vld [vmem:[%s2995_s14] ss:$0 sm:$0xff]  ;;  %s2996_s20 = sld [smem:[#allocation19_spill]]  ;;  %s2443_s1 = smov 88  }
  0x3e   : > { %2109 = vmatprep.subr.bf16.mxu1 %v2439_v9  ;;  %2135 = vmatprep.mubr.msk.bf16.mxu0 %vm2440_vm2, %v2439_v9  ;;  %s2444_s23 = smov 120   ;;  %s2445_s5 = smov 56  }
  0x3f   : > { %s2446_s25 = smov 80   ;;  %s2447_s28 = smov 112  }
  0x40   : > { %s2448_s13 = smov 48   ;;  %s2449_s19 = smov 72  }
  0x41   : > { %v2680_v1 = vld [vmem:[#allocation2] sm:$0xff]  ;;  %2110 = vmatpush3.bf16.msra.mxu1 %v2310_v10  ;;  %s2450_s14 = smov 104   ;;  %s2997_s22 = scalar_lea.vmem %s2938_s6, %s2623_s24 }
  0x42   : > { %v747_v2 = vsel %vm746_vm1, %v2680_v1, 0.0  ;;  %2115 = vmatprep.subr.bf16.mxu1 %v2439_v9  ;;  %v950_v10 = vld [vmem:[%s2645_s27] sm:$0xf] }
  0x43   : > { %748 = vadd.xlane.f32.xlu0 %v747_v2  ;;  %v2724_v31 = vld [vmem:[%s2996_s20] sm:$0xff] }
  0xcc   : > { %v749_v3 = vpop.xlane.xlu0 %748 }
  0xcd   : > { %v751_v4 = vmul.f32 0.03125, %v749_v3 }
  0xcf   : > { %v752_v5 = vsub.f32 %v2680_v1, %v751_v4 }
  0xd1   : > { %v753_v6 = vmul.f32 %v752_v5, %v752_v5 }
  0xd3   : > { %v754_v7 = vsel %vm746_vm1, %v753_v6, 0.0 }
  0xd4   : > { %755 = vadd.xlane.f32.xlu0 %v754_v7 }
 0x15d   : > { %v756_v11 = vpop.xlane.xlu0 %755 }
 0x15e   : > { %v757_v12 = vmul.f32 0.03125, %v756_v11 }
 0x160   : > { %v758_v13 = vadd.f32 1e-05, %v757_v12 }
 0x162   : > { %2321 = vrsqrt.f32 %v758_v13  ;;  %v1116_v13 = vsel %vm905_vm4, %v950_v10, 0 }
 0x16f   : > { %v2322_v14 = vpop.eup %2321 }
 0x170   : > { %v760_v16 = vmul.f32 %v2322_v14, %v752_v5  ;;  %v2023_v5 = vld [vmem:[%s2645_s27 + $0x4] sm:$0xf] }
 0x171   : > { %v1070_v6 = vsel %vm905_vm4, %v2023_v5, 0 }
 0x172   : > { %v767_v18 = vmul.f32 %v2014_v15, %v760_v16 }
 0x174   : > { %v774_v19 = vadd.f32 %v2015_v17, %v767_v18 }
 0x176   : > { %v775_v20 = vpack.c.bf16 %v774_v19, %v774_v19 }
 0x178   : > { %2112 = vmatmul.mubr.msk.bf16.vlgmr.msra.gmra.mxu1 %vm746_vm1, %v775_v20 }
 0x179   : > { %2117 = vmatprep.mubr.msk.bf16.mxu1 %vm2440_vm2, %v2439_v9 }
 0x238   : > { %v829_v21 = vpop.f32.mrf.mxu1 }
 0x239   : > { %v2709_v22 = vpack.c.bf16 %v829_v21, %v829_v21 }
 0x23a   : > { %v2113_v23 = vpop.f32.mrf.mxu1 }
 0x23b   : > { %900 = vrot.lane.b32.xlu0 %v2709_v22, %s2441_s16  ;;  %837 = vrot.lane.b32.xlu1 %v2709_v22, %s2442_s15  ;;  %s2451_s16 = smov 40  }
 0x23c   : > { %v832_v24 = vpop.f32.mrf.mxu1 }
 0x23e   : > { %v2114_v25 = vpop.f32.mrf.mxu1 }
 0x2ad   : > { %v838_v26 = vpop.permute.xlu1 %837  ;;  %v901_v28 = vpop.permute.xlu0 %900 }
 0x2ae   : > { %v844_v27 = vsel %vm839_vm3, %v838_v26, 0  ;;  %v907_v29 = vsel %vm905_vm4, %v901_v28, 0 }
 0x2af   : > { %2116 = vmatpush3.bf16.xpose.msra.mxu1 %v844_v27 }
 0x2b0   : > { %2121 = vmatprep.subr.bf16.mxu1 %v2439_v9 }
 0x2b6   : > { %2118 = vmatmul.mubr.msk.bf16.vlgmr.msra.gmra.mxu1 %vm839_vm3, %v2709_v22 }
 0x2b7   : > { %2122 = vmatpush3.bf16.msra.mxu1 %v907_v29  ;;  %2123 = vmatprep.mubr.msk.bf16.mxu1 %vm2440_vm2, %v2439_v9 }
 0x2b8   : > { %2127 = vmatprep.subr.bf16.mxu1 %v2439_v9 }
 0x376   : > { %v880_v30 = vpop.f32.mrf.mxu1 }
 0x377   : > { %v886_v32 = vmul.f32 0.35355338, %v880_v30 }
 0x378   : > { %v2119_v33 = vpop.f32.mrf.mxu1 }
 0x379   : > { %v887_v34 = vadd.f32 %v886_v32, %v2724_v31 }
 0x37a   : > { %v883_v35 = vpop.f32.mrf.mxu1 }
 0x37b   : > { %v888_v36 = vsel %vm839_vm3, %v887_v34, -inf }
 0x37c   : > { %889 = vmax.xlane.f32.xlu1 %v888_v36  ;;  %v2120_v37 = vpop.f32.mrf.mxu1 }
 0x405   : > { %v890_v38 = vpop.xlane.xlu1 %889 }
 0x406   : > { %v891_v39 = vsub.f32 %v887_v34, %v890_v38 }
 0x408   : > { %v892_v40 = vmul.f32 1.442695, %v891_v39 }
 0x40a   : > { %2323 = vpow2.f32 %v892_v40 }
 0x417   : > { %v2324_v41 = vpop.eup %2323 }
 0x418   : > { %v894_v42 = vsel %vm839_vm3, %v2324_v41, 0.0 }
 0x419   : > { %895 = vadd.xlane.f32.xlu0 %v894_v42 }
 0x42f   : > { %953 = vrot.lane.b32.xlu0 %v2709_v22, %s2443_s1 }
 0x433   : > { %951 = vrot.lane.b32.xlu0 %v2709_v22, %s2444_s23  ;;  %s2998_s23 = scalar_lea.vmem %s2940_s8, %s2623_s24 }
 0x4a2   : > { %v896_v43 = vpop.xlane.xlu0 %895 }
 0x4a3   : > { %2325 = vrcp.f32 %v896_v43 }
 0x4a6   : > { %v954_v46 = vpop.permute.xlu0 %953 }
 0x4a7   : > { %v959_v48 = vsel %vm839_vm3, %v954_v46, 0 }
 0x4aa   : > { %v952_v49 = vpop.permute.xlu0 %951 }
 0x4b0   : > { %v2326_v44 = vpop.eup %2325 }
 0x4b1   : > { %v898_v45 = vmul.f32 %v2326_v44, %v2324_v41 }
 0x4b3   : > { %v899_v47 = vpack.c.bf16 %v898_v45, %v898_v45 }
 0x4b5   : > { %2124 = vmatmul.mubr.msk.bf16.vlgmr.msra.gmra.mxu1 %vm839_vm3, %v899_v47 }
 0x4b6   : > { %2128 = vmatpush3.bf16.xpose.msra.mxu1 %v959_v48  ;;  %2129 = vmatprep.mubr.msk.bf16.mxu1 %vm2440_vm2, %v2439_v9 }
 0x4b7   : > { %2139 = vmatprep.subr.bf16.mxu1 %v2439_v9 }
 0x4bd   : > { %2130 = vmatmul.mubr.msk.bf16.vlgmr.msra.gmra.mxu1 %vm839_vm3, %v952_v49 }
 0x4be   : > { %2141 = vmatprep.mubr.msk.bf16.mxu1 %vm2440_vm2, %v2439_v9  ;;  %2140 = vmatpush3.bf16.msra.mxu1 %v1070_v6 }
 0x4bf   : > { %2151 = vmatprep.subr.bf16.mxu1 %v2439_v9 }
 0x575   : > { %v943_v50 = vpop.f32.mrf.mxu1 }
 0x576   : > { %v949_v15 = vpack.c.bf16 %v943_v50, %v943_v50 }
 0x577   : > { %v2125_v51 = vpop.f32.mrf.mxu1 }
 0x579   : > { %v946_v52 = vpop.f32.mrf.mxu1 }
 0x57b   : > { %v2126_v53 = vpop.f32.mrf.mxu1 }
 0x57d   : > { %v995_v54 = vpop.f32.mrf.mxu1 }
 0x57e   : > { %v1001_v55 = vmul.f32 0.35355338, %v995_v54  ;;  %v2028_v54 = vld [vmem:[%s2645_s27 + $0x8] sm:$0xf] }
 0x57f   : > { %v2131_v56 = vpop.f32.mrf.mxu1 }
 0x580   : > { %v1002_v57 = vadd.f32 %v1001_v55, %v2724_v31  ;;  %v1277_v55 = vsel %vm905_vm4, %v2028_v54, 0 }
 0x581   : > { %v998_v58 = vpop.f32.mrf.mxu1 }
 0x582   : > { %v1003_v59 = vsel %vm839_vm3, %v1002_v57, -inf }
 0x583   : > { %1004 = vmax.xlane.f32.xlu1 %v1003_v59  ;;  %v2132_v60 = vpop.f32.mrf.mxu1 }
 0x594   : > { %1015 = vrot.lane.b32.xlu1 %v2709_v22, %s2445_s5 }
 0x598   : > { %1160 = vrot.lane.b32.xlu1 %v2709_v22, %s2446_s25 }
 0x59c   : > { %1158 = vrot.lane.b32.xlu1 %v2709_v22, %s2447_s28 }
 0x60c   : > { %v1005_v61 = vpop.xlane.xlu1 %1004 }
 0x60d   : > { %v1006_v62 = vsub.f32 %v1002_v57, %v1005_v61 }
 0x60f   : > { %v1007_v63 = vmul.f32 1.442695, %v1006_v62 }
 0x610   : > { %v1016_v0 = vpop.permute.xlu1 %1015 }
 0x611   : > { %2327 = vpow2.f32 %v1007_v63  ;;  %v1021_v2 = vsel %vm905_vm4, %v1016_v0, 0 }
 0x612   : > { %2134 = vmatpush3.bf16.msra.mxu0 %v1021_v2 }
 0x613   : > { %2145 = vmatprep.subr.bf16.mxu0 %v2439_v9 }
 0x614   : > { %v1161_v17 = vpop.permute.xlu1 %1160 }
 0x615   : > { %v1166_v21 = vsel %vm839_vm3, %v1161_v17, 0 }
 0x618   : > { %v1159_v26 = vpop.permute.xlu1 %1158 }
 0x61e   : > { %v2328_v3 = vpop.eup %2327 }
 0x61f   : > { %v1009_v4 = vsel %vm839_vm3, %v2328_v3, 0.0 }
 0x620   : > { %1010 = vadd.xlane.f32.xlu0 %v1009_v4 }
 0x636   : > { %1222 = vrot.lane.b32.xlu0 %v2709_v22, %s2448_s13 }
 0x6a9   : > { %v1011_v7 = vpop.xlane.xlu0 %1010 }
 0x6aa   : > { %2329 = vrcp.f32 %v1011_v7 }
 0x6ad   : > { %v1223_v14 = vpop.permute.xlu0 %1222 }
 0x6ae   : > { %v1228_v16 = vsel %vm905_vm4, %v1223_v14, 0 }
 0x6b7   : > { %v2330_v8 = vpop.eup %2329 }
 0x6b8   : > { %v1013_v11 = vmul.f32 %v2330_v8, %v2328_v3 }
 0x6ba   : > { %v1014_v12 = vpack.c.bf16 %v1013_v11, %v1013_v11 }
 0x6bc   : > { %2136 = vmatmul.mubr.msk.bf16.vlgmr.msra.gmra.mxu0 %vm839_vm3, %v1014_v12 }
 0x6bd   : > { %2146 = vmatpush3.bf16.msra.mxu0 %v1116_v13  ;;  %2147 = vmatprep.mubr.msk.bf16.mxu0 %vm2440_vm2, %v2439_v9 }
 0x6be   : > { %2157 = vmatprep.subr.bf16.mxu0 %v2439_v9 }
 0x6c4   : > { %2148 = vmatmul.mubr.msk.bf16.vlgmr.msra.gmra.mxu0 %vm839_vm3, %v949_v15 }
 0x6c5   : > { %2158 = vmatpush3.bf16.msra.mxu0 %v1228_v16  ;;  %2159 = vmatprep.mubr.msk.bf16.mxu0 %vm2440_vm2, %v2439_v9  ;;  %v2032_v16 = vld [vmem:[%s2645_s27 + $0xc] sm:$0xf] }
 0x6c6   : > { %2169 = vmatprep.subr.bf16.mxu0 %v2439_v9  ;;  %v1439_v17 = vsel %vm905_vm4, %v2032_v16, 0 }
 0x77c   : > { %v1057_v18 = vpop.f32.mrf.mxu0 }
 0x77d   : > { %v1063_v19 = vpack.c.bf16 %v1057_v18, %v1057_v18 }
 0x77e   : > { %v2137_v20 = vpop.f32.mrf.mxu0 }
 0x77f   : > { %2142 = vmatmul.mubr.msk.bf16.vlgmr.msra.gmra.mxu1 %vm839_vm3, %v1063_v19 }
 0x780   : > { %2152 = vmatpush3.bf16.xpose.msra.mxu1 %v1166_v21  ;;  %v1060_v23 = vpop.f32.mrf.mxu0  ;;  %2153 = vmatprep.mubr.msk.bf16.mxu1 %vm2440_vm2, %v2439_v9 }
 0x781   : > { %2163 = vmatprep.subr.bf16.mxu1 %v2439_v9 }
 0x782   : > { %v2138_v24 = vpop.f32.mrf.mxu0 }
 0x784   : > { %v2767_v25 = vpop.f32.mrf.mxu0 }
 0x786   : > { %v2149_v27 = vpop.f32.mrf.mxu0 }
 0x787   : > { %2154 = vmatmul.mubr.msk.bf16.vlgmr.msra.gmra.mxu1 %vm839_vm3, %v1159_v26 }
 0x788   : > { %v1155_v28 = vpop.f32.mrf.mxu0  ;;  %2165 = vmatprep.mubr.msk.bf16.mxu1 %vm2440_vm2, %v2439_v9  ;;  %2164 = vmatpush3.bf16.msra.mxu1 %v1277_v55  ;;  %v2035_v55 = vld [vmem:[%s714_s17] ss:$0 sm:$0xff] }
 0x789   : > { %2175 = vmatprep.subr.bf16.mxu1 %v2439_v9 }
 0x78a   : > { %v2150_v29 = vpop.f32.mrf.mxu0 }
 0x83f   : > { %v2772_v30 = vpop.f32.mrf.mxu1 }
 0x840   : > { %v1153_v12 = vadd.f32 %v2767_v25, %v2772_v30 }
 0x841   : > { %v2143_v32 = vpop.f32.mrf.mxu1 }
 0x842   : > { %v2034_v32 = vld [vmem:[%s2997_s22] ss:$0 sm:$0xff] }
 0x843   : > { %v1109_v33 = vpop.f32.mrf.mxu1 }
 0x845   : > { %v2144_v34 = vpop.f32.mrf.mxu1 }
 0x847   : > { %v1202_v35 = vpop.f32.mrf.mxu1 }
 0x848   : > { %v1208_v36 = vmul.f32 0.35355338, %v1202_v35 }
 0x849   : > { %v2155_v37 = vpop.f32.mrf.mxu1 }
 0x84a   : > { %v1209_v38 = vadd.f32 %v1208_v36, %v2724_v31 }
 0x84b   : > { %v1205_v39 = vpop.f32.mrf.mxu1 }
 0x84c   : > { %v1210_v40 = vsel %vm839_vm3, %v1209_v38, -inf }
 0x84d   : > { %1211 = vmax.xlane.f32.xlu1 %v1210_v40  ;;  %v2156_v41 = vpop.f32.mrf.mxu1 }
 0x8d6   : > { %v1212_v42 = vpop.xlane.xlu1 %1211 }
 0x8d7   : > { %v1213_v43 = vsub.f32 %v1209_v38, %v1212_v42 }
 0x8d9   : > { %v1214_v44 = vmul.f32 1.442695, %v1213_v43 }
 0x8db   : > { %2331 = vpow2.f32 %v1214_v44  ;;  %v2312_v44 = vld [vmem:[%s2662_s30] sm:$0xff]  }
 0x8e8   : > { %v2332_v45 = vpop.eup %2331 }
 0x8e9   : > { %v1216_v46 = vsel %vm839_vm3, %v2332_v45, 0.0 }
 0x8ea   : > { %1217 = vadd.xlane.f32.xlu0 %v1216_v46  ;;  %v2314_v46 = vld [vmem:[%s2672_s26 + $0x30] sm:$0xff]  }
 0x900   : > { %1322 = vrot.lane.b32.xlu0 %v2709_v22, %s2449_s19 }
 0x904   : > { %1320 = vrot.lane.b32.xlu0 %v2709_v22, %s2450_s14 }
 0x973   : > { %v1218_v47 = vpop.xlane.xlu0 %1217 }
 0x974   : > { %2333 = vrcp.f32 %v1218_v47  ;;  %v2315_v47 = vld [vmem:[%s2672_s26 + $0x28] sm:$0xff]  }
 0x977   : > { %v1323_v50 = vpop.permute.xlu0 %1322 }
 0x978   : > { %v1328_v52 = vsel %vm839_vm3, %v1323_v50, 0  ;;  %v2318_v50 = vld [vmem:[%s2672_s26 + $0x10] sm:$0xff]  }
 0x97b   : > { %v1321_v53 = vpop.permute.xlu0 %1320 }
 0x981   : > { %v2334_v48 = vpop.eup %2333 }
 0x982   : > { %v1220_v49 = vmul.f32 %v2334_v48, %v2332_v45  ;;  %v2313_v45 = vld [vmem:[%s2672_s26 + $0x38] sm:$0xff]   ;;  %v2316_v48 = vld [vmem:[%s2672_s26 + $0x20] sm:$0xff]  }
 0x984   : > { %v1221_v51 = vpack.c.bf16 %v1220_v49, %v1220_v49  ;;  %v2317_v49 = vld [vmem:[%s2672_s26 + $0x18] sm:$0xff]  }
 0x986   : > { %2160 = vmatmul.mubr.msk.bf16.vlgmr.msra.gmra.mxu0 %vm839_vm3, %v1221_v51 }
 0x987   : > { %2170 = vmatpush3.bf16.xpose.msra.mxu0 %v1328_v52  ;;  %2171 = vmatprep.mubr.msk.bf16.mxu0 %vm2440_vm2, %v2439_v9 }
 0x988   : > { %2181 = vmatprep.subr.bf16.mxu0 %v2439_v9 }
 0x98e   : > { %2172 = vmatmul.mubr.msk.bf16.vlgmr.msra.gmra.mxu0 %vm839_vm3, %v1321_v53 }
 0x98f   : > { %2183 = vmatprep.mubr.msk.bf16.mxu0 %vm2440_vm2, %v2439_v9  ;;  %2182 = vmatpush3.bf16.msra.mxu0 %v1439_v17 }
 0x990   : > { %2195 = vmatprep.subr.bf16.mxu0 %v2439_v9 }
 0xa46   : > { %v1264_v56 = vpop.f32.mrf.mxu0 }
 0xa47   : > { %v1270_v57 = vpack.c.bf16 %v1264_v56, %v1264_v56 }
 0xa48   : > { %v2161_v58 = vpop.f32.mrf.mxu0 }
 0xa49   : > { %2166 = vmatmul.mubr.msk.bf16.vlgmr.msra.gmra.mxu1 %vm839_vm3, %v1270_v57  ;;  %v2036_v57 = vld [vmem:[%s2998_s23] ss:$0 sm:$0xff] }
 0xa4a   : > { %v1267_v59 = vpop.f32.mrf.mxu0  ;;  %2177 = vmatprep.mubr.msk.bf16.mxu1 %vm2440_vm2, %v2439_v9 }
 0xa4c   : > { %v2162_v60 = vpop.f32.mrf.mxu0 }
 0xa4e   : > { %v1364_v61 = vpop.f32.mrf.mxu0 }
 0xa4f   : > { %v1370_v62 = vmul.f32 0.35355338, %v1364_v61  ;;  %v2319_v61 = vld [vmem:[%s2672_s26 + $0x8] sm:$0xff]  }
 0xa50   : > { %v2173_v63 = vpop.f32.mrf.mxu0 }
 0xa51   : > { %v1371_v0 = vadd.f32 %v1370_v62, %v2724_v31  ;;  %v2320_v62 = vld [vmem:[%s2672_s26] sm:$0xff]  }
 0xa52   : > { %v1367_v2 = vpop.f32.mrf.mxu0  ;;  %v2037_v63 = vld [vmem:[%s725_s4] ss:$0 sm:$0xff]  ;;  %s2999_s4 = sld [smem:[#allocation9_spill]] }
 0xa53   : > { %v1372_v3 = vsel %vm839_vm3, %v1371_v0, -inf }
 0xa54   : > { %1373 = vmax.xlane.f32.xlu1 %v1372_v3  ;;  %v2174_v4 = vpop.f32.mrf.mxu0 }
 0xa58   : > { %p2050_p1 = scmp.ne.s32.totalorder %s2999_s4, 1 }
 0xa59   : > { %s3001_s27 = sld [smem:[#allocation23_spill]] (!%p2050_p1) }
 0xa5a   : > { %s3003_s1 = sld [smem:[#allocation26_spill]] (!%p2050_p1) }
 0xa65   : > { %1384 = vrot.lane.b32.xlu1 %v2709_v22, %s2451_s16 }
 0xadd   : > { %v1374_v5 = vpop.xlane.xlu1 %1373 }
 0xade   : > { %v1375_v6 = vsub.f32 %v1371_v0, %v1374_v5 }
 0xae0   : > { %v1376_v7 = vmul.f32 1.442695, %v1375_v6 }
 0xae1   : > { %v1385_v8 = vpop.permute.xlu1 %1384 }
 0xae2   : > { %2335 = vpow2.f32 %v1376_v7  ;;  %v1390_v10 = vsel %vm905_vm4, %v1385_v8, 0 }
 0xae3   : > { %2176 = vmatpush3.bf16.msra.mxu1 %v1390_v10 }
 0xae4   : > { %2187 = vmatprep.subr.bf16.mxu1 %v2439_v9 }
 0xaef   : > { %v2336_v31 = vpop.eup %2335 }
 0xaf0   : > { %v1378_v11 = vsel %vm839_vm3, %v2336_v31, 0.0 }
 0xaf1   : > { %1379 = vadd.xlane.f32.xlu0 %v1378_v11 }
 0xb09   : > { %v1313_v13 = vpop.f32.mrf.mxu1 }
 0xb0a   : > { %v1319_v22 = vadd.f32 %v1313_v13, %v1153_v12 }
 0xb0b   : > { %v2167_v14 = vpop.f32.mrf.mxu1 }
 0xb0d   : > { %v1316_v15 = vpop.f32.mrf.mxu1 }
 0xb0f   : > { %v2168_v18 = vpop.f32.mrf.mxu1 }
 0xb7a   : > { %v1380_v19 = vpop.xlane.xlu0 %1379 }
 0xb7b   : > { %2337 = vrcp.f32 %v1380_v19 }
 0xb88   : > { %v2338_v20 = vpop.eup %2337 }
 0xb89   : > { %v1382_v21 = vmul.f32 %v2338_v20, %v2336_v31 }
 0xb8b   : > { %v1383_v23 = vpack.c.bf16 %v1382_v21, %v1382_v21 }
 0xb8d   : > { %2178 = vmatmul.mubr.msk.bf16.vlgmr.msra.gmra.mxu1 %vm839_vm3, %v1383_v23 }
 0xb8e   : > { %2191 = vmatprep.mubr.msk.bf16.mxu1 %vm2440_vm2, %v2439_v9 }
 0xc4d   : > { %v1426_v24 = vpop.f32.mrf.mxu1 }
 0xc4e   : > { %v1432_v25 = vpack.c.bf16 %v1426_v24, %v1426_v24 }
 0xc4f   : > { %v2179_v26 = vpop.f32.mrf.mxu1 }
 0xc50   : > { %2184 = vmatmul.mubr.msk.bf16.vlgmr.msra.gmra.mxu0 %vm839_vm3, %v1432_v25 }
 0xc51   : > { %v1429_v27 = vpop.f32.mrf.mxu1  ;;  %2211 = vmatprep.mubr.msk.bf16.mxu0 %vm2440_vm2, %v2439_v9  ;;  %2196 = vmatpush3.bf16.msra.mxu0 %v2313_v45 }
 0xc52   : > { %2197 = vmatprep.subr.bf16.mxu0 %v2439_v9 }
 0xc53   : > { %v2180_v28 = vpop.f32.mrf.mxu1 }
 0xc55   : > { %2198 = vmatpush3.bf16.msra.mxu0 %v2314_v46 }
 0xc56   : > { %2199 = vmatprep.subr.bf16.mxu0 %v2439_v9 }
 0xc59   : > { %2200 = vmatpush3.bf16.msra.mxu0 %v2315_v47 }
 0xc5a   : > { %2201 = vmatprep.subr.bf16.mxu0 %v2439_v9 }
 0xc5d   : > { %2202 = vmatpush3.bf16.msra.mxu0 %v2316_v48 }
 0xc5e   : > { %2203 = vmatprep.subr.bf16.mxu0 %v2439_v9 }
 0xc61   : > { %2204 = vmatpush3.bf16.msra.mxu0 %v2317_v49 }
 0xc62   : > { %2205 = vmatprep.subr.bf16.mxu0 %v2439_v9 }
 0xc65   : > { %2206 = vmatpush3.bf16.msra.mxu0 %v2318_v50 }
 0xc66   : > { %2207 = vmatprep.subr.bf16.mxu0 %v2439_v9 }
 0xc69   : > { %2208 = vmatpush3.bf16.msra.mxu0 %v2319_v61 }
 0xc6a   : > { %2209 = vmatprep.subr.bf16.mxu0 %v2439_v9 }
 0xc6d   : > { %2210 = vmatpush3.bf16.msra.mxu0 %v2320_v62 }
 0xd10   : > { %v1475_v29 = vpop.f32.mrf.mxu0 }
 0xd11   : > { %v1481_v30 = vadd.f32 %v1475_v29, %v1319_v22 }
 0xd12   : > { %v2185_v33 = vpop.f32.mrf.mxu0 }
 0xd13   : > { %v1482_v34 = vadd.f32 %v1481_v30, %v2680_v1  ;;  %v2311_v1 = vld [vmem:[%s2662_s30 + $0x8] sm:$0xff]   ;;  %s3002_s30 = sld [smem:[#allocation24_spill]] (!%p2050_p1) }
 0xd14   : > { %v1478_v35 = vpop.f32.mrf.mxu0  ;;  %2188 = vmatpush3.bf16.msra.mxu1 %v2311_v1 }
 0xd15   : > { %v2816_v36 = vadd.f32 %v2034_v32, %v1482_v34  ;;  %2189 = vmatprep.subr.bf16.mxu1 %v2439_v9  ;;  %v2041_v9 = vld [vmem:[%s733_s21] ss:$0 sm:$0xff]  ;;  %s3000_s21 = sld [smem:[#allocation25_spill]] (!%p2050_p1) }
 0xd16   : > { %v2186_v37 = vpop.f32.mrf.mxu0 }
 0xd17   : > { %v1493_v38 = vsel %vm746_vm1, %v2816_v36, 0.0 }
 0xd18   : > { %1494 = vadd.xlane.f32.xlu1 %v1493_v38  ;;  %2190 = vmatpush3.bf16.msra.mxu1 %v2312_v44 }
 0xda1   : > { %v1495_v39 = vpop.xlane.xlu1 %1494 }
 0xda2   : > { %v1496_v40 = vmul.f32 0.03125, %v1495_v39 }
 0xda4   : > { %v1497_v41 = vsub.f32 %v2816_v36, %v1496_v40 }
 0xda6   : > { %v1498_v42 = vmul.f32 %v1497_v41, %v1497_v41 }
 0xda8   : > { %v1499_v43 = vsel %vm746_vm1, %v1498_v42, 0.0 }
 0xda9   : > { %1500 = vadd.xlane.f32.xlu0 %v1499_v43 }
 0xe32   : > { %v1501_v51 = vpop.xlane.xlu0 %1500 }
 0xe33   : > { %v1502_v52 = vmul.f32 0.03125, %v1501_v51 }
 0xe35   : > { %v1503_v53 = vadd.f32 1e-05, %v1502_v52 }
 0xe37   : > { %2339 = vrsqrt.f32 %v1503_v53 }
 0xe44   : > { %v2340_v54 = vpop.eup %2339 }
 0xe45   : > { %v1505_v56 = vmul.f32 %v2340_v54, %v1497_v41 }
 0xe47   : > { %v1512_v58 = vmul.f32 %v2035_v55, %v1505_v56 }
 0xe49   : > { %v1519_v59 = vadd.f32 %v2036_v57, %v1512_v58 }
 0xe4b   : > { %v1520_v60 = vpack.c.bf16 %v1519_v59, %v1519_v59 }
 0xe4d   : > { %2192 = vmatmul.mubr.msk.bf16.vlgmr.msra.gmra.mxu1 %vm746_vm1, %v1520_v60 }
 0xf0d   : > { %v1581_v0 = vpop.f32.mrf.mxu1 }
 0xf0e   : > { %v1582_v2 = vadd.f32 %v2037_v63, %v1581_v0 }
 0xf0f   : > { %v2193_v3 = vpop.f32.mrf.mxu1 }
 0xf10   : > { %v1587_v4 = vmax.f32 %v1582_v2, 0.0 }
 0xf11   : > { %v1584_v5 = vpop.f32.mrf.mxu1 }
 0xf12   : > { %v1588_v6 = vpack.c.bf16 %v1587_v4, %v1587_v4 }
 0xf13   : > { %v2194_v7 = vpop.f32.mrf.mxu1 }
 0xf14   : > { %2212 = vmatmul.mubr.bf16.vlgmr.msra.gmra.mxu0 %v1588_v6 }
 0xfd4   : > { %v1694_v8 = vpop.f32.mrf.mxu0 }
 0xfd5   : > { %v1695_v10 = vadd.f32 %v2041_v9, %v1694_v8 }
 0xfd6   : > { %v2213_v31 = vpop.f32.mrf.mxu0  ;;  %1705 = sbr.rel (%p2050_p1) target bundleno = 4568 (0x11d8), region = 96 }
 0xfd7   : > { %v1700_v11 = vadd.f32 %v1695_v10, %v2816_v36 }
 0xfd8   : > { %v1697_v12 = vpop.f32.mrf.mxu0 }
 0xfd9   : > { %1701 = vst.msk [vmem:[#allocation2] sm:$0xff] %vm746_vm1, %v1700_v11 }
 0xfda   : > { %v2214_v13 = vpop.f32.mrf.mxu0 }
 0xfdb   : > { %v1708_v22 = vsel %vm746_vm1, %v1700_v11, 0.0  ;;  %v2341_v19 = vld [vmem:[%s3000_s21 + $0x8] sm:$0xff]   ;;  %v2452_v20 = vmov 0.0   ;;  %vm2453_vm5 = vmmov 0   ;;  %v2342_v21 = vld [vmem:[%s3000_s21] sm:$0xff]  }
 0xfdc   : > { %1709 = vadd.xlane.f32.xlu0 %v1708_v22  ;;  %2215 = vmatprep.subr.bf16.mxu0 %v2452_v20  ;;  %v2051_v27 = vld [vmem:[%s3001_s27] ss:$0 sm:$0xff] }
 0xfdd   : > { %2219 = vmatprep.mubr.msk.bf16.mxu0 %vm2453_vm5, %v2452_v20  ;;  %2216 = vmatpush3.bf16.msra.mxu0 %v2341_v19  ;;  %v2052_v29 = vld [vmem:[%s3002_s30] ss:$0 sm:$0xff] }
 0xfde   : > { %2217 = vmatprep.subr.bf16.mxu0 %v2452_v20  ;;  %v2053_v34 = vld [vmem:[%s3003_s1] ss:$0 sm:$0xff] }
 0xfe1   : > { %2218 = vmatpush3.bf16.msra.mxu0 %v2342_v21 }
0x1065   : > { %v1710_v14 = vpop.xlane.xlu0 %1709 }
0x1066   : > { %v1711_v15 = vmul.f32 0.03125, %v1710_v14 }
0x1068   : > { %v1712_v16 = vsub.f32 %v1700_v11, %v1711_v15 }
0x106a   : > { %v1713_v17 = vmul.f32 %v1712_v16, %v1712_v16 }
0x106c   : > { %v1714_v18 = vsel %vm746_vm1, %v1713_v17, 0.0 }
0x106d   : > { %1715 = vadd.xlane.f32.xlu0 %v1714_v18 }
0x10f6   : > { %v1716_v23 = vpop.xlane.xlu0 %1715 }
0x10f7   : > { %v1717_v24 = vmul.f32 0.03125, %v1716_v23 }
0x10f9   : > { %v1718_v25 = vadd.f32 1e-05, %v1717_v24 }
0x10fb   : > { %2343 = vrsqrt.f32 %v1718_v25 }
0x1108   : > { %v2344_v26 = vpop.eup %2343 }
0x1109   : > { %v1720_v28 = vmul.f32 %v2344_v26, %v1712_v16 }
0x110b   : > { %v1727_v30 = vmul.f32 %v2051_v27, %v1720_v28 }
0x110d   : > { %v1734_v32 = vadd.f32 %v2052_v29, %v1727_v30 }
0x110f   : > { %v1735_v33 = vpack.c.bf16 %v1734_v32, %v1734_v32 }
0x1111   : > { %2220 = vmatmul.mubr.msk.bf16.vlgmr.msra.gmra.mxu0 %vm746_vm1, %v1735_v33 }
0x11d1   : > { %v1796_v35 = vpop.f32.mrf.mxu0 }
0x11d2   : > { %v1797_v36 = vadd.f32 %v2053_v34, %v1796_v35 }
0x11d3   : > { %v2221_v37 = vpop.f32.mrf.mxu0 }
0x11d4   : > { %1802 = vst [vmem:[%s688_s18] sm:$0xff] %v1797_v36 }
0x11d5   : > { %v1799_v38 = vpop.f32.mrf.mxu0 }
0x11d7   : > { %v2222_v39 = vpop.f32.mrf.mxu0 }
0x11d8 PF: > { %s3004_s23 = sld [smem:[#allocation10_spill]]  ;;  %s1817_s19 = sshll.u32 %s688_s18, 4  ;;  %s1818_s19 = int_to_ptr.vmem [resolvable:$true] %s1817_s19 }
0x11d9   : > { %s3005_s5 = sld [smem:[#allocation7_spill]]  ;;  %s2345_s27 = scalar_lea.vmem %s1818_s19, 128 }
0x11da   : > { %s3007_s24 = sld [smem:[#allocation27_spill]]  ;;  %p2346_p2 = scmp.ne.s32.totalorder %s1818_s19, %s2345_s27 }
0x11db   : > { %s2454_s15 = smov [#allocation3]  }
0x11dc   : > { %p2347_p4 = pnand %p2346_p2, %p2594_p3  ;;  %s2349_s22 = sshll.u32 %s2454_s15, 4  ;;  %s2350_s22 = int_to_ptr.vmem [resolvable:$false] %s2349_s22 }
0x11dd   : > { %s2351_s30 = scalar_lea.vmem %s2350_s22, 256  ;;  %p2352_p6 = scmp.lt.s32.totalorder %s1818_s19, %s2350_s22 }
0x11de   : > { %s2058_s25 = sshll.u32 %s3004_s23, 7  ;;  %p2348_p5 = pneg %p2347_p4 }
0x11df   : > { %s3009_s14 = sand.u32 1, %s3005_s5   ;;  %p2353_p7 = scmp.lt.s32.totalorder %s2351_s30, %s2345_s27 }
0x11e0   : > { %s3008_s13 = smov %s3007_s24  ;;  %s1815_s26 = scalar_lea.hbm %s3007_s24, %s2058_s25 }
0x11e1   : > { %s1804_s16 = scalar_lea.sflag [#allocation4], %s3009_s14  ;;  %p2354_p8 = por %p2353_p7, %p2352_p6 }
0x11e3   : > { %p2355_p10 = pnand %p2354_p8, %p2348_p5 }
0x11e5   : > { %2358 = shalt.err (!%p2355_p10)
}
0x11e6   : > { %s2359_s0 = scalar_lea.hbm %s1815_s26, 128  ;;  %s2363_s20 = scalar_lea.hbm %s3008_s13, 256 }
0x11e7   : > { %p2360_p11 = scmp.ne.s32.totalorder %s1815_s26, %s2359_s0  ;;  %p2364_p0 = scmp.lt.s32.totalorder %s1815_s26, %s3008_s13 }
0x11e8   : > { %p2365_p1 = scmp.lt.s32.totalorder %s2363_s20, %s2359_s0 }
0x11e9   : > { %p2361_p12 = pnand %p2360_p11, %p2594_p3 }
0x11ea   : > { %p2366_p2 = por %p2365_p1, %p2364_p0 }
0x11eb   : > { %p2362_p13 = pneg %p2361_p12 }
0x11ed   : > { %p2367_p4 = pnand %p2366_p2, %p2362_p13 }
0x11ef   : > { %2370 = shalt.err (!%p2367_p4)
}
0x11f0   : > { %2223 = dma.vmem_to_hbm [thread:$0]  (%p2594_p3), %s1818_s19, 128, %s1815_s26, %s1804_s16  }
0x11f1 PF: > { %s3010_s5 = sld [smem:[#allocation13_spill]] }
0x11f2   : > { %s3011_s25 = sld [smem:[#allocation6_spill]] }
0x11f7   : > { %p2229_p5 = scmp.ge.s32.totalorder %s3010_s5, 2 }
0x11f8   : > { %s1829_s4 = sand.u32 1, %s3011_s25  }
0x11f9   : > { %p2226_p6 = pnand %p2229_p5, %p2604_p9  ;;  %s1830_s24 = scalar_lea.sflag [#allocation4], %s1829_s4 }
0x11fb   : > { %p2227_p7 = pneg %p2226_p6 }
0x11fd   : > { %2404 = dma.done.wait (%p2227_p7), %s1830_s24, 128  }
0x11fe   : > { %2406 = vsyncadd (%p2227_p7), %s1830_s24, 4294967168  ;;  %s30_s30 = sadd.s32 1, %s3010_s5   ;;  %s3013_s24 = sld [smem:[#allocation7_spill]] }
0x11ff   : > { %p27_p8 = scmp.ge.s32.totalorder %s30_s30, 6   ;;  %s3014_s25 = sld [smem:[#allocation8_spill]] }
0x1200   : > { %s3015_s26 = sld [smem:[#allocation18_spill]] }
0x1201   : > { %s3016_s27 = sld [smem:[#allocation11_spill]]  ;;  %29 = sbr.rel (!%p27_p8) target bundleno = 15 (0xf), region = 167 }
0x1202   : > { %s3017_s28 = sld [smem:[#allocation12_spill]] }
0x1203   : > { %s3018_s29 = sld [smem:[#allocation14_spill]] }
0x1204   : > { %s3019_s0 = sld [smem:[#allocation16_spill]] }
0x1206   :  { %1835 = vsyncpa [#allocation4], 1 }
0x1207   :  { %1837 = vsyncpa [#allocation4 + $0x1], 1 }

</bundles_post_ra>
